<compile_context>
chip_gen: v7x
topology: tpu7x:2x2x1
jax: 0.10.0
libtpu: 0.0.40
codegen_flags: <defaults>
</compile_context>

<pallas_src>
from functools import partial

import jax
import jax.numpy as jnp
import numpy as np
from jax.experimental import pallas as pl
from jax.experimental.pallas import tpu as pltpu


def _dis2dis3_kernel(w2_ref, w3_ref, p_ref, out_ref, *, C, och1, och2):
    # w2_ref: (och1, 9*C) weight columns for the 2x2 branch, laid out on the
    #         tap-major row grid of the 3x3 patches (only the 4 shared taps
    #         are ever read; the rest are zero filler).
    # w3_ref: (och2, 9*C) weight columns for the 3x3 branch.
    # p_ref : (9*C, lb)   tap-major patch rows, lanes = flattened (n, h, w).
    # out   : (och1+och2, lb) lane-dense slab, OC on the sublane axis.
    SHARED = (4, 5, 7, 8)  # 3x3 taps (kh,kw) in {1,2}x{1,2} == the 2x2 taps
    lb = out_ref.shape[-1]

    # Weights are tiny: load once per grid step, slice values in the loop.
    w2 = w2_ref[...]                                   # (och1, 9*C)
    w3 = w3_ref[...]                                   # (och2, 9*C)

    acc2 = jnp.zeros((och1, lb), jnp.float32)          # max(|.|) >= 0 => 0-init ok
    acc3 = jnp.zeros((och2, lb), jnp.float32)

    # TODO(synk): for production C, replace the unrolled row loop with
    # lax.fori_loop(..., unroll=4) (dynamic pl.ds row slices + shared-tap mask)
    # to bound trace time; 9*C is small for this config.
    for t in range(9):
        for c in range(C):
            r = t * C + c
            pr = p_ref[pl.ds(r, 1), :]                 # (1, lb) sublane-bcast row
            acc3 = jnp.maximum(acc3, jnp.abs(pr - w3[:, r:r + 1]))
            if t in SHARED:
                acc2 = jnp.maximum(acc2, jnp.abs(pr - w2[:, r:r + 1]))

    # Single dense, unmasked (OC, lb) store.
    out_ref[...] = jnp.concatenate([acc2, acc3], axis=0).astype(out_ref.dtype)


def _pick_lane_block(total_lanes, rows, oc, itemsize,
                     vmem_budget=12 << 20, acc_vregs=16):
    """Lane-block size: VMEM-budgeted, vreg-pressure-bounded, v7x-2-TC aware."""
    # Bound 1: double-buffered patch + output blocks under a conservative
    # budget (safe vs v5e 16 MiB default scoped and v7x 64 MiB physical VMEM).
    per_lane = (rows + oc) * itemsize * 2
    lb = max(512, (vmem_budget // per_lane) // 512 * 512)
    # Bound 2: running-max accumulator (OC, lb) must stay in vregs (no spill).
    lb = min(lb, max(512, (acc_vregs * 4096 // max(oc * itemsize, 1)) // 512 * 512))
    # Bound 3: never exceed one (padded) pass over the data.
    lb = min(lb, -(-total_lanes // 512) * 512)
    # Bound 4: keep >= 2 parallel grid steps when there is enough work
    # (v7x megacore: 2 TensorCores share the 'parallel' grid axis).
    if total_lanes >= 2 * 512:
        lb = min(lb, max(512, (-(-total_lanes // 1024)) * 512))
    return max(lb, 512)


def dis2dis3(x, w2, w3, *, lane_block=None):
    """x: (N,C,H,W) f32; w2: (och1,C,2,2); w3: (och2,C,3,3) -> (N,och1+och2,H,W)."""
    N, C, H, W = x.shape
    och1, och2 = w2.shape[0], w3.shape[0]
    OC = och1 + och2
    HW = H * W
    Ltot = N * HW
    dtype = x.dtype
    itemsize = jnp.dtype(dtype).itemsize
    K3 = 3
    R = K3 * K3 * C  # tap-major rows of the single (3x3) patch slab

    # --- tap-major im2col of the 3x3 branch only (2x2 taps are a subset) ---
    xpad = jnp.pad(x, ((0, 0), (0, 0), (1, 1), (1, 1)))
    taps = [xpad[:, :, kh:kh + H, kw:kw + W] for kh in range(K3) for kw in range(K3)]
    p = jnp.stack(taps, axis=0)                 # (9, N, C, H, W)
    p = p.transpose(0, 2, 1, 3, 4)              # (9, C, N, H, W): rows = t*C + c
    p3 = p.reshape(R, Ltot)                     # lanes = n*HW + h*W + w

    # --- weight columns aligned to the tap-major row order ---
    w3c = (w3.reshape(och2, C, K3 * K3).transpose(0, 2, 1)
             .reshape(och2, R).astype(dtype))
    w2g = jnp.zeros((och1, K3 * K3, C), dtype)
    for kh2 in range(2):
        for kw2 in range(2):
            t = (kh2 + 1) * K3 + (kw2 + 1)      # 2x2 tap == 3x3 tap (kh+1, kw+1)
            w2g = w2g.at[:, t, :].set(w2[:, :, kh2, kw2].astype(dtype))
    w2c = w2g.reshape(och1, R)

    # --- lane blocking (batch folded into the lane axis) ---
    lb = lane_block or _pick_lane_block(Ltot, R, OC, itemsize)
    Lpad = pl.cdiv(Ltot, lb) * lb
    if Lpad != Ltot:
        p3 = jnp.pad(p3, ((0, 0), (0, Lpad - Ltot)))  # zero lanes, sliced off below

    kern = partial(_dis2dis3_kernel, C=C, och1=och1, och2=och2)
    out_flat = pl.pallas_call(
        kern,
        out_shape=jax.ShapeDtypeStruct((OC, Lpad), dtype),
        grid=(Lpad // lb,),
        in_specs=[
            pl.BlockSpec((och1, R), lambda i: (0, 0)),   # 2x2 weight columns
            pl.BlockSpec((och2, R), lambda i: (0, 0)),   # 3x3 weight columns
            pl.BlockSpec((R, lb), lambda i: (0, i)),     # tap-major patches
        ],
        out_specs=pl.BlockSpec((OC, lb), lambda i: (0, i)),
        compiler_params=pltpu.CompilerParams(
            dimension_semantics=("parallel",),
            vmem_limit_bytes=32 << 20),
    )(w2c, w3c, p3)

    return out_flat[:, :Ltot].reshape(OC, N, H, W).transpose(1, 0, 2, 3)


def _reference(x, w2, w3):
    N, C, H, W = x.shape

    def dist_conv(w, k):
        pb, pa = (k - 1) // 2, k // 2
        xpad = jnp.pad(x, ((0, 0), (0, 0), (pb, pa), (pb, pa)))
        patches = jnp.stack(
            [xpad[:, :, kh:kh + H, kw:kw + W] for kh in range(k) for kw in range(k)],
            axis=2)                                           # (N, C, k*k, H, W)
        wf = w.reshape(w.shape[0], C, k * k)
        return jnp.max(jnp.abs(patches[:, None] - wf[None, :, :, :, None, None]),
                       axis=(2, 3))

    return jnp.concatenate([dist_conv(w2, 2), dist_conv(w3, 3)], axis=1)


if __name__ == "__main__":
    # module config: in_channels=4, out_channels=8 -> och_1=4 (2x2), och_2=4 (3x3)
    N, C, H, W = 2, 4, 16, 16
    OCH = 8
    och1 = OCH // 2
    och2 = OCH - och1

    key = jax.random.PRNGKey(0)
    kx, k2, k3 = jax.random.split(key, 3)
    x = jax.random.normal(kx, (N, C, H, W), dtype=jnp.float32)
    w2 = jax.random.normal(k2, (och1, C, 2, 2), dtype=jnp.float32) * 0.5
    w3 = jax.random.normal(k3, (och2, C, 3, 3), dtype=jnp.float32) * 0.5

    out = jax.block_until_ready(dis2dis3(x, w2, w3))
    ref = jax.block_until_ready(_reference(x, w2, w3))

    assert out.shape == (N, OCH, H, W), out.shape
    np.testing.assert_allclose(np.asarray(out), np.asarray(ref),
                               rtol=1e-6, atol=1e-6)
    print("KERNEL_OK")
</pallas_src>

<mosaic_0001>
module attributes {stable_mosaic.version = 11 : i64} {
  func.func @_dis2dis3_kernel(%arg0: i32, %arg1: memref<4x36xf32, #tpu.memory_space<vmem>>, %arg2: memref<4x36xf32, #tpu.memory_space<vmem>>, %arg3: memref<36x512xf32, #tpu.memory_space<vmem>>, %arg4: memref<8x512xf32, #tpu.memory_space<vmem>>) attributes {dimension_semantics = [#tpu.dimension_semantics<parallel>], iteration_bounds = array<i64: 1>, scalar_prefetch = 0 : i64, scratch_operands = 0 : i64, tpu.core_type = #tpu.core_type<tc>, window_params = [{pipeline_mode = #tpu.pipeline_mode<synchronous>, transform_indices = @transform_0, window_bounds = array<i64: 4, 36>}, {pipeline_mode = #tpu.pipeline_mode<synchronous>, transform_indices = @transform_1, window_bounds = array<i64: 4, 36>}, {transform_indices = @transform_2, window_bounds = array<i64: 36, 512>}, {transform_indices = @transform_3, window_bounds = array<i64: 8, 512>}]} {
    %c0 = arith.constant 0 : index
    %c0_0 = arith.constant 0 : index
    %0 = vector.load %arg1[%c0, %c0_0] : memref<4x36xf32, #tpu.memory_space<vmem>>, vector<4x36xf32>
    %c0_1 = arith.constant 0 : index
    %c0_2 = arith.constant 0 : index
    %1 = vector.load %arg2[%c0_1, %c0_2] : memref<4x36xf32, #tpu.memory_space<vmem>>, vector<4x36xf32>
    %cst = arith.constant 0.000000e+00 : f32
    %2 = vector.broadcast %cst : f32 to vector<4x512xf32>
    %cst_3 = arith.constant 0.000000e+00 : f32
    %3 = vector.broadcast %cst_3 : f32 to vector<4x512xf32>
    %c0_4 = arith.constant 0 : index
    %c0_5 = arith.constant 0 : index
    %4 = vector.load %arg3[%c0_4, %c0_5] : memref<36x512xf32, #tpu.memory_space<vmem>>, vector<1x512xf32>
    %5 = vector.extract_strided_slice %1 {offsets = [0, 0], sizes = [4, 1], strides = [1, 1]} : vector<4x36xf32> to vector<4x1xf32>
    %6 = vector.broadcast %4 : vector<1x512xf32> to vector<4x512xf32>
    %7 = vector.broadcast %5 : vector<4x1xf32> to vector<4x512xf32>
    %8 = arith.subf %6, %7 : vector<4x512xf32>
    %9 = math.absf %8 : vector<4x512xf32>
    %10 = arith.maximumf %3, %9 : vector<4x512xf32>
    %c1 = arith.constant 1 : index
    %c0_6 = arith.constant 0 : index
    %11 = vector.load %arg3[%c1, %c0_6] : memref<36x512xf32, #tpu.memory_space<vmem>>, vector<1x512xf32>
    %12 = vector.extract_strided_slice %1 {offsets = [0, 1], sizes = [4, 1], strides = [1, 1]} : vector<4x36xf32> to vector<4x1xf32>
    %13 = vector.broadcast %11 : vector<1x512xf32> to vector<4x512xf32>
    %14 = vector.broadcast %12 : vector<4x1xf32> to vector<4x512xf32>
    %15 = arith.subf %13, %14 : vector<4x512xf32>
    %16 = math.absf %15 : vector<4x512xf32>
    %17 = arith.maximumf %10, %16 : vector<4x512xf32>
    %c2 = arith.constant 2 : index
    %c0_7 = arith.constant 0 : index
    %18 = vector.load %arg3[%c2, %c0_7] : memref<36x512xf32, #tpu.memory_space<vmem>>, vector<1x512xf32>
    %19 = vector.extract_strided_slice %1 {offsets = [0, 2], sizes = [4, 1], strides = [1, 1]} : vector<4x36xf32> to vector<4x1xf32>
    %20 = vector.broadcast %18 : vector<1x512xf32> to vector<4x512xf32>
    %21 = vector.broadcast %19 : vector<4x1xf32> to vector<4x512xf32>
    %22 = arith.subf %20, %21 : vector<4x512xf32>
    %23 = math.absf %22 : vector<4x512xf32>
    %24 = arith.maximumf %17, %23 : vector<4x512xf32>
    %c3 = arith.constant 3 : index
    %c0_8 = arith.constant 0 : index
    %25 = vector.load %arg3[%c3, %c0_8] : memref<36x512xf32, #tpu.memory_space<vmem>>, vector<1x512xf32>
    %26 = vector.extract_strided_slice %1 {offsets = [0, 3], sizes = [4, 1], strides = [1, 1]} : vector<4x36xf32> to vector<4x1xf32>
    %27 = vector.broadcast %25 : vector<1x512xf32> to vector<4x512xf32>
    %28 = vector.broadcast %26 : vector<4x1xf32> to vector<4x512xf32>
    %29 = arith.subf %27, %28 : vector<4x512xf32>
    %30 = math.absf %29 : vector<4x512xf32>
    %31 = arith.maximumf %24, %30 : vector<4x512xf32>
    %c4 = arith.constant 4 : index
    %c0_9 = arith.constant 0 : index
    %32 = vector.load %arg3[%c4, %c0_9] : memref<36x512xf32, #tpu.memory_space<vmem>>, vector<1x512xf32>
    %33 = vector.extract_strided_slice %1 {offsets = [0, 4], sizes = [4, 1], strides = [1, 1]} : vector<4x36xf32> to vector<4x1xf32>
    %34 = vector.broadcast %32 : vector<1x512xf32> to vector<4x512xf32>
    %35 = vector.broadcast %33 : vector<4x1xf32> to vector<4x512xf32>
    %36 = arith.subf %34, %35 : vector<4x512xf32>
    %37 = math.absf %36 : vector<4x512xf32>
    %38 = arith.maximumf %31, %37 : vector<4x512xf32>
    %c5 = arith.constant 5 : index
    %c0_10 = arith.constant 0 : index
    %39 = vector.load %arg3[%c5, %c0_10] : memref<36x512xf32, #tpu.memory_space<vmem>>, vector<1x512xf32>
    %40 = vector.extract_strided_slice %1 {offsets = [0, 5], sizes = [4, 1], strides = [1, 1]} : vector<4x36xf32> to vector<4x1xf32>
    %41 = vector.broadcast %39 : vector<1x512xf32> to vector<4x512xf32>
    %42 = vector.broadcast %40 : vector<4x1xf32> to vector<4x512xf32>
    %43 = arith.subf %41, %42 : vector<4x512xf32>
    %44 = math.absf %43 : vector<4x512xf32>
    %45 = arith.maximumf %38, %44 : vector<4x512xf32>
    %c6 = arith.constant 6 : index
    %c0_11 = arith.constant 0 : index
    %46 = vector.load %arg3[%c6, %c0_11] : memref<36x512xf32, #tpu.memory_space<vmem>>, vector<1x512xf32>
    %47 = vector.extract_strided_slice %1 {offsets = [0, 6], sizes = [4, 1], strides = [1, 1]} : vector<4x36xf32> to vector<4x1xf32>
    %48 = vector.broadcast %46 : vector<1x512xf32> to vector<4x512xf32>
    %49 = vector.broadcast %47 : vector<4x1xf32> to vector<4x512xf32>
    %50 = arith.subf %48, %49 : vector<4x512xf32>
    %51 = math.absf %50 : vector<4x512xf32>
    %52 = arith.maximumf %45, %51 : vector<4x512xf32>
    %c7 = arith.constant 7 : index
    %c0_12 = arith.constant 0 : index
    %53 = vector.load %arg3[%c7, %c0_12] : memref<36x512xf32, #tpu.memory_space<vmem>>, vector<1x512xf32>
    %54 = vector.extract_strided_slice %1 {offsets = [0, 7], sizes = [4, 1], strides = [1, 1]} : vector<4x36xf32> to vector<4x1xf32>
    %55 = vector.broadcast %53 : vector<1x512xf32> to vector<4x512xf32>
    %56 = vector.broadcast %54 : vector<4x1xf32> to vector<4x512xf32>
    %57 = arith.subf %55, %56 : vector<4x512xf32>
    %58 = math.absf %57 : vector<4x512xf32>
    %59 = arith.maximumf %52, %58 : vector<4x512xf32>
    %c8 = arith.constant 8 : index
    %c0_13 = arith.constant 0 : index
    %60 = vector.load %arg3[%c8, %c0_13] : memref<36x512xf32, #tpu.memory_space<vmem>>, vector<1x512xf32>
    %61 = vector.extract_strided_slice %1 {offsets = [0, 8], sizes = [4, 1], strides = [1, 1]} : vector<4x36xf32> to vector<4x1xf32>
    %62 = vector.broadcast %60 : vector<1x512xf32> to vector<4x512xf32>
    %63 = vector.broadcast %61 : vector<4x1xf32> to vector<4x512xf32>
    %64 = arith.subf %62, %63 : vector<4x512xf32>
    %65 = math.absf %64 : vector<4x512xf32>
    %66 = arith.maximumf %59, %65 : vector<4x512xf32>
    %c9 = arith.constant 9 : index
    %c0_14 = arith.constant 0 : index
    %67 = vector.load %arg3[%c9, %c0_14] : memref<36x512xf32, #tpu.memory_space<vmem>>, vector<1x512xf32>
    %68 = vector.extract_strided_slice %1 {offsets = [0, 9], sizes = [4, 1], strides = [1, 1]} : vector<4x36xf32> to vector<4x1xf32>
    %69 = vector.broadcast %67 : vector<1x512xf32> to vector<4x512xf32>
    %70 = vector.broadcast %68 : vector<4x1xf32> to vector<4x512xf32>
    %71 = arith.subf %69, %70 : vector<4x512xf32>
    %72 = math.absf %71 : vector<4x512xf32>
    %73 = arith.maximumf %66, %72 : vector<4x512xf32>
    %c10 = arith.constant 10 : index
    %c0_15 = arith.constant 0 : index
    %74 = vector.load %arg3[%c10, %c0_15] : memref<36x512xf32, #tpu.memory_space<vmem>>, vector<1x512xf32>
    %75 = vector.extract_strided_slice %1 {offsets = [0, 10], sizes = [4, 1], strides = [1, 1]} : vector<4x36xf32> to vector<4x1xf32>
    %76 = vector.broadcast %74 : vector<1x512xf32> to vector<4x512xf32>
    %77 = vector.broadcast %75 : vector<4x1xf32> to vector<4x512xf32>
    %78 = arith.subf %76, %77 : vector<4x512xf32>
    %79 = math.absf %78 : vector<4x512xf32>
    %80 = arith.maximumf %73, %79 : vector<4x512xf32>
    %c11 = arith.constant 11 : index
    %c0_16 = arith.constant 0 : index
    %81 = vector.load %arg3[%c11, %c0_16] : memref<36x512xf32, #tpu.memory_space<vmem>>, vector<1x512xf32>
    %82 = vector.extract_strided_slice %1 {offsets = [0, 11], sizes = [4, 1], strides = [1, 1]} : vector<4x36xf32> to vector<4x1xf32>
    %83 = vector.broadcast %81 : vector<1x512xf32> to vector<4x512xf32>
    %84 = vector.broadcast %82 : vector<4x1xf32> to vector<4x512xf32>
    %85 = arith.subf %83, %84 : vector<4x512xf32>
    %86 = math.absf %85 : vector<4x512xf32>
    %87 = arith.maximumf %80, %86 : vector<4x512xf32>
    %c12 = arith.constant 12 : index
    %c0_17 = arith.constant 0 : index
    %88 = vector.load %arg3[%c12, %c0_17] : memref<36x512xf32, #tpu.memory_space<vmem>>, vector<1x512xf32>
    %89 = vector.extract_strided_slice %1 {offsets = [0, 12], sizes = [4, 1], strides = [1, 1]} : vector<4x36xf32> to vector<4x1xf32>
    %90 = vector.broadcast %88 : vector<1x512xf32> to vector<4x512xf32>
    %91 = vector.broadcast %89 : vector<4x1xf32> to vector<4x512xf32>
    %92 = arith.subf %90, %91 : vector<4x512xf32>
    %93 = math.absf %92 : vector<4x512xf32>
    %94 = arith.maximumf %87, %93 : vector<4x512xf32>
    %c13 = arith.constant 13 : index
    %c0_18 = arith.constant 0 : index
    %95 = vector.load %arg3[%c13, %c0_18] : memref<36x512xf32, #tpu.memory_space<vmem>>, vector<1x512xf32>
    %96 = vector.extract_strided_slice %1 {offsets = [0, 13], sizes = [4, 1], strides = [1, 1]} : vector<4x36xf32> to vector<4x1xf32>
    %97 = vector.broadcast %95 : vector<1x512xf32> to vector<4x512xf32>
    %98 = vector.broadcast %96 : vector<4x1xf32> to vector<4x512xf32>
    %99 = arith.subf %97, %98 : vector<4x512xf32>
    %100 = math.absf %99 : vector<4x512xf32>
    %101 = arith.maximumf %94, %100 : vector<4x512xf32>
    %c14 = arith.constant 14 : index
    %c0_19 = arith.constant 0 : index
    %102 = vector.load %arg3[%c14, %c0_19] : memref<36x512xf32, #tpu.memory_space<vmem>>, vector<1x512xf32>
    %103 = vector.extract_strided_slice %1 {offsets = [0, 14], sizes = [4, 1], strides = [1, 1]} : vector<4x36xf32> to vector<4x1xf32>
    %104 = vector.broadcast %102 : vector<1x512xf32> to vector<4x512xf32>
    %105 = vector.broadcast %103 : vector<4x1xf32> to vector<4x512xf32>
    %106 = arith.subf %104, %105 : vector<4x512xf32>
    %107 = math.absf %106 : vector<4x512xf32>
    %108 = arith.maximumf %101, %107 : vector<4x512xf32>
    %c15 = arith.constant 15 : index
    %c0_20 = arith.constant 0 : index
    %109 = vector.load %arg3[%c15, %c0_20] : memref<36x512xf32, #tpu.memory_space<vmem>>, vector<1x512xf32>
    %110 = vector.extract_strided_slice %1 {offsets = [0, 15], sizes = [4, 1], strides = [1, 1]} : vector<4x36xf32> to vector<4x1xf32>
    %111 = vector.broadcast %109 : vector<1x512xf32> to vector<4x512xf32>
    %112 = vector.broadcast %110 : vector<4x1xf32> to vector<4x512xf32>
    %113 = arith.subf %111, %112 : vector<4x512xf32>
    %114 = math.absf %113 : vector<4x512xf32>
    %115 = arith.maximumf %108, %114 : vector<4x512xf32>
    %c16 = arith.constant 16 : index
    %c0_21 = arith.constant 0 : index
    %116 = vector.load %arg3[%c16, %c0_21] : memref<36x512xf32, #tpu.memory_space<vmem>>, vector<1x512xf32>
    %117 = vector.extract_strided_slice %1 {offsets = [0, 16], sizes = [4, 1], strides = [1, 1]} : vector<4x36xf32> to vector<4x1xf32>
    %118 = vector.broadcast %116 : vector<1x512xf32> to vector<4x512xf32>
    %119 = vector.broadcast %117 : vector<4x1xf32> to vector<4x512xf32>
    %120 = arith.subf %118, %119 : vector<4x512xf32>
    %121 = math.absf %120 : vector<4x512xf32>
    %122 = arith.maximumf %115, %121 : vector<4x512xf32>
    %123 = vector.extract_strided_slice %0 {offsets = [0, 16], sizes = [4, 1], strides = [1, 1]} : vector<4x36xf32> to vector<4x1xf32>
    %124 = vector.broadcast %116 : vector<1x512xf32> to vector<4x512xf32>
    %125 = vector.broadcast %123 : vector<4x1xf32> to vector<4x512xf32>
    %126 = arith.subf %124, %125 : vector<4x512xf32>
    %127 = math.absf %126 : vector<4x512xf32>
    %128 = arith.maximumf %2, %127 : vector<4x512xf32>
    %c17 = arith.constant 17 : index
    %c0_22 = arith.constant 0 : index
    %129 = vector.load %arg3[%c17, %c0_22] : memref<36x512xf32, #tpu.memory_space<vmem>>, vector<1x512xf32>
    %130 = vector.extract_strided_slice %1 {offsets = [0, 17], sizes = [4, 1], strides = [1, 1]} : vector<4x36xf32> to vector<4x1xf32>
    %131 = vector.broadcast %129 : vector<1x512xf32> to vector<4x512xf32>
    %132 = vector.broadcast %130 : vector<4x1xf32> to vector<4x512xf32>
    %133 = arith.subf %131, %132 : vector<4x512xf32>
    %134 = math.absf %133 : vector<4x512xf32>
    %135 = arith.maximumf %122, %134 : vector<4x512xf32>
    %136 = vector.extract_strided_slice %0 {offsets = [0, 17], sizes = [4, 1], strides = [1, 1]} : vector<4x36xf32> to vector<4x1xf32>
    %137 = vector.broadcast %129 : vector<1x512xf32> to vector<4x512xf32>
    %138 = vector.broadcast %136 : vector<4x1xf32> to vector<4x512xf32>
    %139 = arith.subf %137, %138 : vector<4x512xf32>
    %140 = math.absf %139 : vector<4x512xf32>
    %141 = arith.maximumf %128, %140 : vector<4x512xf32>
    %c18 = arith.constant 18 : index
    %c0_23 = arith.constant 0 : index
    %142 = vector.load %arg3[%c18, %c0_23] : memref<36x512xf32, #tpu.memory_space<vmem>>, vector<1x512xf32>
    %143 = vector.extract_strided_slice %1 {offsets = [0, 18], sizes = [4, 1], strides = [1, 1]} : vector<4x36xf32> to vector<4x1xf32>
    %144 = vector.broadcast %142 : vector<1x512xf32> to vector<4x512xf32>
    %145 = vector.broadcast %143 : vector<4x1xf32> to vector<4x512xf32>
    %146 = arith.subf %144, %145 : vector<4x512xf32>
    %147 = math.absf %146 : vector<4x512xf32>
    %148 = arith.maximumf %135, %147 : vector<4x512xf32>
    %149 = vector.extract_strided_slice %0 {offsets = [0, 18], sizes = [4, 1], strides = [1, 1]} : vector<4x36xf32> to vector<4x1xf32>
    %150 = vector.broadcast %142 : vector<1x512xf32> to vector<4x512xf32>
    %151 = vector.broadcast %149 : vector<4x1xf32> to vector<4x512xf32>
    %152 = arith.subf %150, %151 : vector<4x512xf32>
    %153 = math.absf %152 : vector<4x512xf32>
    %154 = arith.maximumf %141, %153 : vector<4x512xf32>
    %c19 = arith.constant 19 : index
    %c0_24 = arith.constant 0 : index
    %155 = vector.load %arg3[%c19, %c0_24] : memref<36x512xf32, #tpu.memory_space<vmem>>, vector<1x512xf32>
    %156 = vector.extract_strided_slice %1 {offsets = [0, 19], sizes = [4, 1], strides = [1, 1]} : vector<4x36xf32> to vector<4x1xf32>
    %157 = vector.broadcast %155 : vector<1x512xf32> to vector<4x512xf32>
    %158 = vector.broadcast %156 : vector<4x1xf32> to vector<4x512xf32>
    %159 = arith.subf %157, %158 : vector<4x512xf32>
    %160 = math.absf %159 : vector<4x512xf32>
    %161 = arith.maximumf %148, %160 : vector<4x512xf32>
    %162 = vector.extract_strided_slice %0 {offsets = [0, 19], sizes = [4, 1], strides = [1, 1]} : vector<4x36xf32> to vector<4x1xf32>
    %163 = vector.broadcast %155 : vector<1x512xf32> to vector<4x512xf32>
    %164 = vector.broadcast %162 : vector<4x1xf32> to vector<4x512xf32>
    %165 = arith.subf %163, %164 : vector<4x512xf32>
    %166 = math.absf %165 : vector<4x512xf32>
    %167 = arith.maximumf %154, %166 : vector<4x512xf32>
    %c20 = arith.constant 20 : index
    %c0_25 = arith.constant 0 : index
    %168 = vector.load %arg3[%c20, %c0_25] : memref<36x512xf32, #tpu.memory_space<vmem>>, vector<1x512xf32>
    %169 = vector.extract_strided_slice %1 {offsets = [0, 20], sizes = [4, 1], strides = [1, 1]} : vector<4x36xf32> to vector<4x1xf32>
    %170 = vector.broadcast %168 : vector<1x512xf32> to vector<4x512xf32>
    %171 = vector.broadcast %169 : vector<4x1xf32> to vector<4x512xf32>
    %172 = arith.subf %170, %171 : vector<4x512xf32>
    %173 = math.absf %172 : vector<4x512xf32>
    %174 = arith.maximumf %161, %173 : vector<4x512xf32>
    %175 = vector.extract_strided_slice %0 {offsets = [0, 20], sizes = [4, 1], strides = [1, 1]} : vector<4x36xf32> to vector<4x1xf32>
    %176 = vector.broadcast %168 : vector<1x512xf32> to vector<4x512xf32>
    %177 = vector.broadcast %175 : vector<4x1xf32> to vector<4x512xf32>
    %178 = arith.subf %176, %177 : vector<4x512xf32>
    %179 = math.absf %178 : vector<4x512xf32>
    %180 = arith.maximumf %167, %179 : vector<4x512xf32>
    %c21 = arith.constant 21 : index
    %c0_26 = arith.constant 0 : index
    %181 = vector.load %arg3[%c21, %c0_26] : memref<36x512xf32, #tpu.memory_space<vmem>>, vector<1x512xf32>
    %182 = vector.extract_strided_slice %1 {offsets = [0, 21], sizes = [4, 1], strides = [1, 1]} : vector<4x36xf32> to vector<4x1xf32>
    %183 = vector.broadcast %181 : vector<1x512xf32> to vector<4x512xf32>
    %184 = vector.broadcast %182 : vector<4x1xf32> to vector<4x512xf32>
    %185 = arith.subf %183, %184 : vector<4x512xf32>
    %186 = math.absf %185 : vector<4x512xf32>
    %187 = arith.maximumf %174, %186 : vector<4x512xf32>
    %188 = vector.extract_strided_slice %0 {offsets = [0, 21], sizes = [4, 1], strides = [1, 1]} : vector<4x36xf32> to vector<4x1xf32>
    %189 = vector.broadcast %181 : vector<1x512xf32> to vector<4x512xf32>
    %190 = vector.broadcast %188 : vector<4x1xf32> to vector<4x512xf32>
    %191 = arith.subf %189, %190 : vector<4x512xf32>
    %192 = math.absf %191 : vector<4x512xf32>
    %193 = arith.maximumf %180, %192 : vector<4x512xf32>
    %c22 = arith.constant 22 : index
    %c0_27 = arith.constant 0 : index
    %194 = vector.load %arg3[%c22, %c0_27] : memref<36x512xf32, #tpu.memory_space<vmem>>, vector<1x512xf32>
    %195 = vector.extract_strided_slice %1 {offsets = [0, 22], sizes = [4, 1], strides = [1, 1]} : vector<4x36xf32> to vector<4x1xf32>
    %196 = vector.broadcast %194 : vector<1x512xf32> to vector<4x512xf32>
    %197 = vector.broadcast %195 : vector<4x1xf32> to vector<4x512xf32>
    %198 = arith.subf %196, %197 : vector<4x512xf32>
    %199 = math.absf %198 : vector<4x512xf32>
    %200 = arith.maximumf %187, %199 : vector<4x512xf32>
    %201 = vector.extract_strided_slice %0 {offsets = [0, 22], sizes = [4, 1], strides = [1, 1]} : vector<4x36xf32> to vector<4x1xf32>
    %202 = vector.broadcast %194 : vector<1x512xf32> to vector<4x512xf32>
    %203 = vector.broadcast %201 : vector<4x1xf32> to vector<4x512xf32>
    %204 = arith.subf %202, %203 : vector<4x512xf32>
    %205 = math.absf %204 : vector<4x512xf32>
    %206 = arith.maximumf %193, %205 : vector<4x512xf32>
    %c23 = arith.constant 23 : index
    %c0_28 = arith.constant 0 : index
    %207 = vector.load %arg3[%c23, %c0_28] : memref<36x512xf32, #tpu.memory_space<vmem>>, vector<1x512xf32>
    %208 = vector.extract_strided_slice %1 {offsets = [0, 23], sizes = [4, 1], strides = [1, 1]} : vector<4x36xf32> to vector<4x1xf32>
    %209 = vector.broadcast %207 : vector<1x512xf32> to vector<4x512xf32>
    %210 = vector.broadcast %208 : vector<4x1xf32> to vector<4x512xf32>
    %211 = arith.subf %209, %210 : vector<4x512xf32>
    %212 = math.absf %211 : vector<4x512xf32>
    %213 = arith.maximumf %200, %212 : vector<4x512xf32>
    %214 = vector.extract_strided_slice %0 {offsets = [0, 23], sizes = [4, 1], strides = [1, 1]} : vector<4x36xf32> to vector<4x1xf32>
    %215 = vector.broadcast %207 : vector<1x512xf32> to vector<4x512xf32>
    %216 = vector.broadcast %214 : vector<4x1xf32> to vector<4x512xf32>
    %217 = arith.subf %215, %216 : vector<4x512xf32>
    %218 = math.absf %217 : vector<4x512xf32>
    %219 = arith.maximumf %206, %218 : vector<4x512xf32>
    %c24 = arith.constant 24 : index
    %c0_29 = arith.constant 0 : index
    %220 = vector.load %arg3[%c24, %c0_29] : memref<36x512xf32, #tpu.memory_space<vmem>>, vector<1x512xf32>
    %221 = vector.extract_strided_slice %1 {offsets = [0, 24], sizes = [4, 1], strides = [1, 1]} : vector<4x36xf32> to vector<4x1xf32>
    %222 = vector.broadcast %220 : vector<1x512xf32> to vector<4x512xf32>
    %223 = vector.broadcast %221 : vector<4x1xf32> to vector<4x512xf32>
    %224 = arith.subf %222, %223 : vector<4x512xf32>
    %225 = math.absf %224 : vector<4x512xf32>
    %226 = arith.maximumf %213, %225 : vector<4x512xf32>
    %c25 = arith.constant 25 : index
    %c0_30 = arith.constant 0 : index
    %227 = vector.load %arg3[%c25, %c0_30] : memref<36x512xf32, #tpu.memory_space<vmem>>, vector<1x512xf32>
    %228 = vector.extract_strided_slice %1 {offsets = [0, 25], sizes = [4, 1], strides = [1, 1]} : vector<4x36xf32> to vector<4x1xf32>
    %229 = vector.broadcast %227 : vector<1x512xf32> to vector<4x512xf32>
    %230 = vector.broadcast %228 : vector<4x1xf32> to vector<4x512xf32>
    %231 = arith.subf %229, %230 : vector<4x512xf32>
    %232 = math.absf %231 : vector<4x512xf32>
    %233 = arith.maximumf %226, %232 : vector<4x512xf32>
    %c26 = arith.constant 26 : index
    %c0_31 = arith.constant 0 : index
    %234 = vector.load %arg3[%c26, %c0_31] : memref<36x512xf32, #tpu.memory_space<vmem>>, vector<1x512xf32>
    %235 = vector.extract_strided_slice %1 {offsets = [0, 26], sizes = [4, 1], strides = [1, 1]} : vector<4x36xf32> to vector<4x1xf32>
    %236 = vector.broadcast %234 : vector<1x512xf32> to vector<4x512xf32>
    %237 = vector.broadcast %235 : vector<4x1xf32> to vector<4x512xf32>
    %238 = arith.subf %236, %237 : vector<4x512xf32>
    %239 = math.absf %238 : vector<4x512xf32>
    %240 = arith.maximumf %233, %239 : vector<4x512xf32>
    %c27 = arith.constant 27 : index
    %c0_32 = arith.constant 0 : index
    %241 = vector.load %arg3[%c27, %c0_32] : memref<36x512xf32, #tpu.memory_space<vmem>>, vector<1x512xf32>
    %242 = vector.extract_strided_slice %1 {offsets = [0, 27], sizes = [4, 1], strides = [1, 1]} : vector<4x36xf32> to vector<4x1xf32>
    %243 = vector.broadcast %241 : vector<1x512xf32> to vector<4x512xf32>
    %244 = vector.broadcast %242 : vector<4x1xf32> to vector<4x512xf32>
    %245 = arith.subf %243, %244 : vector<4x512xf32>
    %246 = math.absf %245 : vector<4x512xf32>
    %247 = arith.maximumf %240, %246 : vector<4x512xf32>
    %c28 = arith.constant 28 : index
    %c0_33 = arith.constant 0 : index
    %248 = vector.load %arg3[%c28, %c0_33] : memref<36x512xf32, #tpu.memory_space<vmem>>, vector<1x512xf32>
    %249 = vector.extract_strided_slice %1 {offsets = [0, 28], sizes = [4, 1], strides = [1, 1]} : vector<4x36xf32> to vector<4x1xf32>
    %250 = vector.broadcast %248 : vector<1x512xf32> to vector<4x512xf32>
    %251 = vector.broadcast %249 : vector<4x1xf32> to vector<4x512xf32>
    %252 = arith.subf %250, %251 : vector<4x512xf32>
    %253 = math.absf %252 : vector<4x512xf32>
    %254 = arith.maximumf %247, %253 : vector<4x512xf32>
    %255 = vector.extract_strided_slice %0 {offsets = [0, 28], sizes = [4, 1], strides = [1, 1]} : vector<4x36xf32> to vector<4x1xf32>
    %256 = vector.broadcast %248 : vector<1x512xf32> to vector<4x512xf32>
    %257 = vector.broadcast %255 : vector<4x1xf32> to vector<4x512xf32>
    %258 = arith.subf %256, %257 : vector<4x512xf32>
    %259 = math.absf %258 : vector<4x512xf32>
    %260 = arith.maximumf %219, %259 : vector<4x512xf32>
    %c29 = arith.constant 29 : index
    %c0_34 = arith.constant 0 : index
    %261 = vector.load %arg3[%c29, %c0_34] : memref<36x512xf32, #tpu.memory_space<vmem>>, vector<1x512xf32>
    %262 = vector.extract_strided_slice %1 {offsets = [0, 29], sizes = [4, 1], strides = [1, 1]} : vector<4x36xf32> to vector<4x1xf32>
    %263 = vector.broadcast %261 : vector<1x512xf32> to vector<4x512xf32>
    %264 = vector.broadcast %262 : vector<4x1xf32> to vector<4x512xf32>
    %265 = arith.subf %263, %264 : vector<4x512xf32>
    %266 = math.absf %265 : vector<4x512xf32>
    %267 = arith.maximumf %254, %266 : vector<4x512xf32>
    %268 = vector.extract_strided_slice %0 {offsets = [0, 29], sizes = [4, 1], strides = [1, 1]} : vector<4x36xf32> to vector<4x1xf32>
    %269 = vector.broadcast %261 : vector<1x512xf32> to vector<4x512xf32>
    %270 = vector.broadcast %268 : vector<4x1xf32> to vector<4x512xf32>
    %271 = arith.subf %269, %270 : vector<4x512xf32>
    %272 = math.absf %271 : vector<4x512xf32>
    %273 = arith.maximumf %260, %272 : vector<4x512xf32>
    %c30 = arith.constant 30 : index
    %c0_35 = arith.constant 0 : index
    %274 = vector.load %arg3[%c30, %c0_35] : memref<36x512xf32, #tpu.memory_space<vmem>>, vector<1x512xf32>
    %275 = vector.extract_strided_slice %1 {offsets = [0, 30], sizes = [4, 1], strides = [1, 1]} : vector<4x36xf32> to vector<4x1xf32>
    %276 = vector.broadcast %274 : vector<1x512xf32> to vector<4x512xf32>
    %277 = vector.broadcast %275 : vector<4x1xf32> to vector<4x512xf32>
    %278 = arith.subf %276, %277 : vector<4x512xf32>
    %279 = math.absf %278 : vector<4x512xf32>
    %280 = arith.maximumf %267, %279 : vector<4x512xf32>
    %281 = vector.extract_strided_slice %0 {offsets = [0, 30], sizes = [4, 1], strides = [1, 1]} : vector<4x36xf32> to vector<4x1xf32>
    %282 = vector.broadcast %274 : vector<1x512xf32> to vector<4x512xf32>
    %283 = vector.broadcast %281 : vector<4x1xf32> to vector<4x512xf32>
    %284 = arith.subf %282, %283 : vector<4x512xf32>
    %285 = math.absf %284 : vector<4x512xf32>
    %286 = arith.maximumf %273, %285 : vector<4x512xf32>
    %c31 = arith.constant 31 : index
    %c0_36 = arith.constant 0 : index
    %287 = vector.load %arg3[%c31, %c0_36] : memref<36x512xf32, #tpu.memory_space<vmem>>, vector<1x512xf32>
    %288 = vector.extract_strided_slice %1 {offsets = [0, 31], sizes = [4, 1], strides = [1, 1]} : vector<4x36xf32> to vector<4x1xf32>
    %289 = vector.broadcast %287 : vector<1x512xf32> to vector<4x512xf32>
    %290 = vector.broadcast %288 : vector<4x1xf32> to vector<4x512xf32>
    %291 = arith.subf %289, %290 : vector<4x512xf32>
    %292 = math.absf %291 : vector<4x512xf32>
    %293 = arith.maximumf %280, %292 : vector<4x512xf32>
    %294 = vector.extract_strided_slice %0 {offsets = [0, 31], sizes = [4, 1], strides = [1, 1]} : vector<4x36xf32> to vector<4x1xf32>
    %295 = vector.broadcast %287 : vector<1x512xf32> to vector<4x512xf32>
    %296 = vector.broadcast %294 : vector<4x1xf32> to vector<4x512xf32>
    %297 = arith.subf %295, %296 : vector<4x512xf32>
    %298 = math.absf %297 : vector<4x512xf32>
    %299 = arith.maximumf %286, %298 : vector<4x512xf32>
    %c32 = arith.constant 32 : index
    %c0_37 = arith.constant 0 : index
    %300 = vector.load %arg3[%c32, %c0_37] : memref<36x512xf32, #tpu.memory_space<vmem>>, vector<1x512xf32>
    %301 = vector.extract_strided_slice %1 {offsets = [0, 32], sizes = [4, 1], strides = [1, 1]} : vector<4x36xf32> to vector<4x1xf32>
    %302 = vector.broadcast %300 : vector<1x512xf32> to vector<4x512xf32>
    %303 = vector.broadcast %301 : vector<4x1xf32> to vector<4x512xf32>
    %304 = arith.subf %302, %303 : vector<4x512xf32>
    %305 = math.absf %304 : vector<4x512xf32>
    %306 = arith.maximumf %293, %305 : vector<4x512xf32>
    %307 = vector.extract_strided_slice %0 {offsets = [0, 32], sizes = [4, 1], strides = [1, 1]} : vector<4x36xf32> to vector<4x1xf32>
    %308 = vector.broadcast %300 : vector<1x512xf32> to vector<4x512xf32>
    %309 = vector.broadcast %307 : vector<4x1xf32> to vector<4x512xf32>
    %310 = arith.subf %308, %309 : vector<4x512xf32>
    %311 = math.absf %310 : vector<4x512xf32>
    %312 = arith.maximumf %299, %311 : vector<4x512xf32>
    %c33 = arith.constant 33 : index
    %c0_38 = arith.constant 0 : index
    %313 = vector.load %arg3[%c33, %c0_38] : memref<36x512xf32, #tpu.memory_space<vmem>>, vector<1x512xf32>
    %314 = vector.extract_strided_slice %1 {offsets = [0, 33], sizes = [4, 1], strides = [1, 1]} : vector<4x36xf32> to vector<4x1xf32>
    %315 = vector.broadcast %313 : vector<1x512xf32> to vector<4x512xf32>
    %316 = vector.broadcast %314 : vector<4x1xf32> to vector<4x512xf32>
    %317 = arith.subf %315, %316 : vector<4x512xf32>
    %318 = math.absf %317 : vector<4x512xf32>
    %319 = arith.maximumf %306, %318 : vector<4x512xf32>
    %320 = vector.extract_strided_slice %0 {offsets = [0, 33], sizes = [4, 1], strides = [1, 1]} : vector<4x36xf32> to vector<4x1xf32>
    %321 = vector.broadcast %313 : vector<1x512xf32> to vector<4x512xf32>
    %322 = vector.broadcast %320 : vector<4x1xf32> to vector<4x512xf32>
    %323 = arith.subf %321, %322 : vector<4x512xf32>
    %324 = math.absf %323 : vector<4x512xf32>
    %325 = arith.maximumf %312, %324 : vector<4x512xf32>
    %c34 = arith.constant 34 : index
    %c0_39 = arith.constant 0 : index
    %326 = vector.load %arg3[%c34, %c0_39] : memref<36x512xf32, #tpu.memory_space<vmem>>, vector<1x512xf32>
    %327 = vector.extract_strided_slice %1 {offsets = [0, 34], sizes = [4, 1], strides = [1, 1]} : vector<4x36xf32> to vector<4x1xf32>
    %328 = vector.broadcast %326 : vector<1x512xf32> to vector<4x512xf32>
    %329 = vector.broadcast %327 : vector<4x1xf32> to vector<4x512xf32>
    %330 = arith.subf %328, %329 : vector<4x512xf32>
    %331 = math.absf %330 : vector<4x512xf32>
    %332 = arith.maximumf %319, %331 : vector<4x512xf32>
    %333 = vector.extract_strided_slice %0 {offsets = [0, 34], sizes = [4, 1], strides = [1, 1]} : vector<4x36xf32> to vector<4x1xf32>
    %334 = vector.broadcast %326 : vector<1x512xf32> to vector<4x512xf32>
    %335 = vector.broadcast %333 : vector<4x1xf32> to vector<4x512xf32>
    %336 = arith.subf %334, %335 : vector<4x512xf32>
    %337 = math.absf %336 : vector<4x512xf32>
    %338 = arith.maximumf %325, %337 : vector<4x512xf32>
    %c35 = arith.constant 35 : index
    %c0_40 = arith.constant 0 : index
    %339 = vector.load %arg3[%c35, %c0_40] : memref<36x512xf32, #tpu.memory_space<vmem>>, vector<1x512xf32>
    %340 = vector.extract_strided_slice %1 {offsets = [0, 35], sizes = [4, 1], strides = [1, 1]} : vector<4x36xf32> to vector<4x1xf32>
    %341 = vector.broadcast %339 : vector<1x512xf32> to vector<4x512xf32>
    %342 = vector.broadcast %340 : vector<4x1xf32> to vector<4x512xf32>
    %343 = arith.subf %341, %342 : vector<4x512xf32>
    %344 = math.absf %343 : vector<4x512xf32>
    %345 = arith.maximumf %332, %344 : vector<4x512xf32>
    %346 = vector.extract_strided_slice %0 {offsets = [0, 35], sizes = [4, 1], strides = [1, 1]} : vector<4x36xf32> to vector<4x1xf32>
    %347 = vector.broadcast %339 : vector<1x512xf32> to vector<4x512xf32>
    %348 = vector.broadcast %346 : vector<4x1xf32> to vector<4x512xf32>
    %349 = arith.subf %347, %348 : vector<4x512xf32>
    %350 = math.absf %349 : vector<4x512xf32>
    %351 = arith.maximumf %338, %350 : vector<4x512xf32>
    %352 = tpu.concatenate %351, %345 in 0 : vector<4x512xf32>, vector<4x512xf32> -> vector<8x512xf32>
    %c0_41 = arith.constant 0 : index
    %c0_42 = arith.constant 0 : index
    %353 = vector.load %arg4[%c0_41, %c0_42] : memref<8x512xf32, #tpu.memory_space<vmem>>, vector<8x512xf32>
    tpu.vector_store %arg4[%c0_41, %c0_42], %352 {strides = array<i32>} : memref<8x512xf32, #tpu.memory_space<vmem>>, vector<8x512xf32>,
    return
  }
  func.func @transform_0(%arg0: i32) -> (i32, i32) {
    %c0_i32 = arith.constant 0 : i32
    %c0_i32_0 = arith.constant 0 : i32
    %c0_i32_1 = arith.constant 0 : i32
    return %c0_i32, %c0_i32_0 : i32, i32
  }
  func.func @transform_1(%arg0: i32) -> (i32, i32) {
    %c0_i32 = arith.constant 0 : i32
    %c0_i32_0 = arith.constant 0 : i32
    %c0_i32_1 = arith.constant 0 : i32
    return %c0_i32, %c0_i32_0 : i32, i32
  }
  func.func @transform_2(%arg0: i32) -> (i32, i32) {
    %c0_i32 = arith.constant 0 : i32
    %c0_i32_0 = arith.constant 0 : i32
    return %c0_i32, %arg0 : i32, i32
  }
  func.func @transform_3(%arg0: i32) -> (i32, i32) {
    %c0_i32 = arith.constant 0 : i32
    %c0_i32_0 = arith.constant 0 : i32
    return %c0_i32, %arg0 : i32, i32
  }
}

</mosaic_0001>

<bundles_post_ra>
// kernel: tpu_custom_call.1
= control target key start
LH: loop header
LB: loop body
LE: loop exit
PB: predicated region body
PF: predicated region fallthrough
CT: control target
= control target key end

     0   :  { %8 = vsyncpa [#allocation3], 0  ;;  %s3037_s0 = inlined_call_operand.hbm [shape: f32[4,36], index: 0, kind: input, shape index: {}]   ;;  %s3038_s1 = inlined_call_operand.hbm [shape: f32[4,36], index: 1, kind: input, shape index: {}]   ;;  %s3039_s2 = inlined_call_operand.hbm [shape: f32[36,512], index: 2, kind: input, shape index: {}]   ;;  %s3040_s3 = inlined_call_operand.hbm [shape: f32[8,512], index: 3, kind: output, shape index: {}]  }
   0x1   :  { %9 = vsyncpa [#allocation6], 0 }
   0x2   :  { %10 = vsyncpa [#allocation4], 0  ;;  %s1935_s12 = smov [#allocation5]   ;;  %s1936_s14 = smov [#allocation2]  }
   0x3   :  { %s27_s13 = sshll.u32 %s1935_s12, 4  ;;  %s17_s15 = sshll.u32 %s1936_s14, 4  ;;  %s28_s13 = int_to_ptr.vmem [resolvable:$true] %s27_s13  ;;  %s18_s15 = int_to_ptr.vmem [resolvable:$true] %s17_s15 }
   0x4   :  { %s1841_s18 = scalar_lea.hbm %s3038_s1, 64 }
   0x5   :  { %p1842_p0 = scmp.ne.s32.totalorder %s3038_s1, %s1841_s18  ;;  %p1845_p1 = scmp.lt.u32.totalorder %s1841_s18, %s3038_s1 }
   0x7   :  { %p1847_p2 = pnand %p1845_p1, %p1842_p0 }
   0x9   :  { %1850 = shalt.err (!%p1847_p2)
}
   0xa   :  { %s1851_s23 = scalar_lea.vmem %s28_s13, 64  ;;  %p1856_p4 = scmp.lt.s32.totalorder %s28_s13, %s28_s13 }
   0xb   :  { %p1852_p3 = scmp.ne.s32.totalorder %s28_s13, %s1851_s23  ;;  %p1857_p5 = scmp.lt.s32.totalorder %s1851_s23, %s1851_s23 }
   0xd   :  { %p1858_p6 = por %p1857_p5, %p1856_p4 }
   0xf   :  { %p1859_p7 = pnand %p1858_p6, %p1852_p3 }
  0x11   :  { %1862 = shalt.err (!%p1859_p7)
}
  0x12   :  { %30 = dma.hbm_to_vmem [thread:$0]  %s3038_s1, 64, %s28_s13, [#allocation6]  }
  0x13   :  { %s1863_s28 = scalar_lea.hbm %s3037_s0, 64 }
  0x14   :  { %p1864_p8 = scmp.ne.s32.totalorder %s3037_s0, %s1863_s28  ;;  %p1867_p9 = scmp.lt.u32.totalorder %s1863_s28, %s3037_s0 }
  0x16   :  { %p1869_p10 = pnand %p1867_p9, %p1864_p8 }
  0x18   :  { %1872 = shalt.err (!%p1869_p10)
}
  0x19   :  { %s1873_s6 = scalar_lea.vmem %s18_s15, 64  ;;  %p1878_p12 = scmp.lt.s32.totalorder %s18_s15, %s18_s15 }
  0x1a   :  { %p1874_p11 = scmp.ne.s32.totalorder %s18_s15, %s1873_s6  ;;  %p1879_p13 = scmp.lt.s32.totalorder %s1873_s6, %s1873_s6 }
  0x1c   :  { %p1880_p0 = por %p1879_p13, %p1878_p12 }
  0x1e   :  { %p1881_p1 = pnand %p1880_p0, %p1874_p11 }
  0x20   :  { %1884 = shalt.err (!%p1881_p1)
}
  0x21   :  { %20 = dma.hbm_to_vmem [thread:$0]  %s3037_s0, 64, %s18_s15, [#allocation3]  }
  0x22   :  { %s1937_s8 = smov [#allocation7]   ;;  %s1885_s12 = scalar_lea.hbm %s3039_s2, 2560 }
  0x23   :  { %s36_s9 = sshll.u32 %s1937_s8, 4  ;;  %p1886_p2 = scmp.ne.s32.totalorder %s3039_s2, %s1885_s12  ;;  %s37_s9 = int_to_ptr.vmem [resolvable:$true] %s36_s9 }
  0x24   :  { %p1889_p3 = scmp.lt.u32.totalorder %s1885_s12, %s3039_s2 }
  0x26   :  { %p1891_p4 = pnand %p1889_p3, %p1886_p2 }
  0x28   :  { %1894 = shalt.err (!%p1891_p4)
}
  0x29   :  { %s1895_s18 = scalar_lea.vmem %s37_s9, 2560  ;;  %p1900_p6 = scmp.lt.s32.totalorder %s37_s9, %s37_s9 }
  0x2a   :  { %p1896_p5 = scmp.ne.s32.totalorder %s37_s9, %s1895_s18  ;;  %p1901_p7 = scmp.lt.s32.totalorder %s1895_s18, %s1895_s18 }
  0x2c   :  { %p1902_p8 = por %p1901_p7, %p1900_p6 }
  0x2e   :  { %p1903_p9 = pnand %p1902_p8, %p1896_p5 }
  0x30   :  { %1906 = shalt.err (!%p1903_p9)
}
  0x31   :  { %s1938_s0 = smov 512   ;;  %s1939_s15 = smov 32  }
  0x32   :  { %42 = dma.hbm_to_vmem [thread:$0]  %s3039_s2, 2560, %s37_s9, [#allocation6], %s1938_s0, %s1938_s0, %s1939_s15  }
  0x33   :  { %1929 = dma.done.wait [#allocation3], 64  }
  0x34   :  { %1930 = vsyncadd [#allocation3], 4294967232 }
  0x35   :  { %1931 = dma.done.wait [#allocation6], 2624  }
  0x36   :  { %1932 = vsyncadd [#allocation6], 4294964672  ;;  %v1940_v0 = vmov 2   ;;  %v1941_v1 = vmov 0   ;;  %v2033_v2 = vld [vmem:[#allocation5] sm:$0xf]  ;;  %v56_v33 = vlaneseq }
  0x37   :  { %1796 = vset.pattern.permute.xlu1 %v1940_v0  ;;  %1794 = vset.pattern.permute.xlu0 %v1941_v1  ;;  %v1942_v3 = vmov 3   ;;  %v1943_v4 = vmov 1   ;;  %v1944_v5 = vmov 4   ;;  %v1945_v6 = vmov 5   ;;  %v2047_v13 = vld [vmem:[#allocation2] sm:$0xf] }
  0x38   :  { %156 = vperm.xlu1 %1796, %v2033_v2   ;;  %78 = vperm.xlu0 %1794, %v2033_v2   ;;  %v1946_v7 = vmov 6   ;;  %v1947_v8 = vmov 8   ;;  %v1948_v9 = vmov 7   ;;  %v1949_v10 = vmov 11   ;;  %s1976_s2 = smov [#allocation8]  }
  0x39   :  { %v1950_v11 = vmov 9   ;;  %v1951_v12 = vmov 14   ;;  %v1952_v14 = vmov 10   ;;  %v1953_v15 = vmov 16   ;;  %s1742_s21 = sshll.u32 %s1976_s2, 4  ;;  %s1743_s21 = int_to_ptr.vmem [resolvable:$true] %s1742_s21 }
  0x3a   :  { %v1954_v16 = vmov 12   ;;  %v1955_v17 = vmov 18   ;;  %v1956_v18 = vmov 13   ;;  %v1957_v19 = vmov 19   ;;  %s1907_s22 = scalar_lea.vmem %s1743_s21, 512  ;;  %p1912_p11 = scmp.lt.s32.totalorder %s1743_s21, %s1743_s21 }
  0x3b   :  { %v1958_v20 = vmov 15   ;;  %v1959_v21 = vmov 21   ;;  %v1960_v22 = vmov 24   ;;  %v1961_v23 = vmov 17   ;;  %p1908_p10 = scmp.ne.s32.totalorder %s1743_s21, %s1907_s22  ;;  %p1913_p12 = scmp.lt.s32.totalorder %s1907_s22, %s1907_s22 }
  0x3c   :  { %1797 = vset.pattern.permute.xlu1 %v1942_v3  ;;  %1795 = vset.pattern.permute.xlu0 %v1943_v4  ;;  %v1962_v24 = vmov 26   ;;  %v1963_v25 = vmov 23   ;;  %v1964_v26 = vmov 29   ;;  %v3044_v27 = vmov 30  }
  0x3d   :  { %195 = vperm.xlu1 %1797, %v2033_v2   ;;  %117 = vperm.xlu0 %1795, %v2033_v2   ;;  %v1966_v28 = vmov 20   ;;  %v3043_v29 = vmov 32   ;;  %v3042_v30 = vmov 33   ;;  %v1969_v31 = vmov 22   ;;  %p1914_p13 = por %p1913_p12, %p1912_p11 }
  0x3e   :  { %v3041_v32 = vmov 35   ;;  %v1971_v34 = vmov 25   ;;  %v57_v35 = vshrl.u32 %v56_v33, 7  ;;  %v2088_v40 = vld [vmem:[#allocation7 + $0x2] ss:$8 sm:$0xf] }
  0x3f   :  { %v2091_v41 = vld [vmem:[#allocation7] ss:$8 sm:$0xf]  ;;  %v2093_v42 = vld [vmem:[#allocation7 + $0x3] ss:$8 sm:$0xf]  ;;  %p1915_p0 = pnand %p1914_p13, %p1908_p10 }
  0x40   :  { %v2080_v36 = vsub.s32 0, %v57_v35  ;;  %v2082_v37 = vsub.s32 1, %v57_v35  ;;  %v2084_v38 = vsub.s32 2, %v57_v35  ;;  %v2086_v39 = vsub.s32 3, %v57_v35 }
  0x41   :  { %1798 = vset.pattern.permute.xlu1 %v1944_v5  ;;  %1799 = vset.pattern.permute.xlu0 %v1945_v6  ;;  %v2101_v46 = vld [vmem:[#allocation7 + $0x1] ss:$8 sm:$0xf]  ;;  %v2111_v51 = vld [vmem:[#allocation7 + $0x4] ss:$8 sm:$0xf] }
  0x42   :  { %234 = vperm.xlu1 %1798, %v2033_v2   ;;  %273 = vperm.xlu0 %1799, %v2033_v2   ;;  %v2121_v56 = vld [vmem:[#allocation7 + $0x5] ss:$8 sm:$0xf]  ;;  %v2132_v61 = vld [vmem:[#allocation7 + $0x6] ss:$8 sm:$0xf]  ;;  %v3110_v43 = vrot.slane %v2088_v40, %v2080_v36  ;;  %v3113_v47 = vrot.slane %v2088_v40, %v2086_v39 }
  0x43   :  { %v2142_v3 = vld [vmem:[#allocation7 + $0x7] ss:$8 sm:$0xf]  ;;  %v2320_v59 = vld [vmem:[#allocation7 + $0x60] ss:$8 sm:$0xf] }
  0x44   :  { %v2221_v35 = vld [vmem:[#allocation7 + $0x27] ss:$8 sm:$0xf]  ;;  %3095 = vst [vmem:[#allocation22_spill] sm:$0xff] %v2320_v59  ;;  %vm1727_vm0 = vcmask 1043456  }
  0x45   :  { %v2335_v55 = vld [vmem:[#allocation7 + $0x61] ss:$8 sm:$0xf]  ;;  %v2349_v50 = vld [vmem:[#allocation7 + $0x62] ss:$8 sm:$0xf] }
  0x46   :  { %1800 = vset.pattern.permute.xlu1 %v1946_v7  ;;  %1802 = vset.pattern.permute.xlu0 %v1947_v8  ;;  %v2152_v8 = vld [vmem:[#allocation7 + $0x20] ss:$8 sm:$0xf]  ;;  %3100 = vst [vmem:[#allocation27_spill] sm:$0xff] %v2335_v55  ;;  %3105 = vst [vmem:[#allocation32_spill] sm:$0xff] %v2349_v50 }
  0x47   :  { %312 = vperm.xlu1 %1800, %v2033_v2   ;;  %390 = vperm.xlu0 %1802, %v2033_v2   ;;  %v2361_v45 = vld [vmem:[#allocation7 + $0x63] ss:$8 sm:$0xf]  ;;  %v1276_v44 = vld [vmem:[#allocation7 + $0x64] ss:$8 sm:$0xf] }
  0x48   :  { %3108 = vst [vmem:[#allocation35_spill] sm:$0xff] %v2361_v45 }
  0x4b   :  { %1801 = vset.pattern.permute.xlu1 %v1948_v9  ;;  %1805 = vset.pattern.permute.xlu0 %v1949_v10 }
  0x4c   :  { %351 = vperm.xlu1 %1801, %v2033_v2   ;;  %507 = vperm.xlu0 %1805, %v2033_v2  }
  0x50   :  { %1803 = vset.pattern.permute.xlu1 %v1950_v11  ;;  %1808 = vset.pattern.permute.xlu0 %v1951_v12 }
  0x51   :  { %429 = vperm.xlu1 %1803, %v2033_v2   ;;  %624 = vperm.xlu0 %1808, %v2033_v2  }
  0x55   :  { %1804 = vset.pattern.permute.xlu1 %v1952_v14  ;;  %1811 = vset.pattern.permute.xlu0 %v1953_v15  ;;  %v2162_v14 = vld [vmem:[#allocation7 + $0x21] ss:$8 sm:$0xf] }
  0x56   :  { %468 = vperm.xlu1 %1804, %v2033_v2   ;;  %719 = vperm.xlu0 %1811, %v2047_v13  }
  0x5a   :  { %1806 = vset.pattern.permute.xlu1 %v1954_v16  ;;  %1813 = vset.pattern.permute.xlu0 %v1955_v17  ;;  %v900_v16 = vld [vmem:[#allocation7 + $0x44] ss:$8 sm:$0xf] }
  0x5b   :  { %546 = vperm.xlu1 %1806, %v2033_v2   ;;  %813 = vperm.xlu0 %1813, %v2033_v2   ;;  %v2302_v1 = vrot.slane %v900_v16, %v2080_v36  ;;  %v2305_v0 = vrot.slane %v900_v16, %v2082_v37  ;;  %v2309_v63 = vrot.slane %v900_v16, %v2084_v38 }
  0x5c   :  { %v2312_v62 = vrot.slane %v900_v16, %v2086_v39 }
  0x5d   :  { %3089 = vst [vmem:[#allocation16_spill] sm:$0xff] %v2302_v1  ;;  %3090 = vst [vmem:[#allocation17_spill] sm:$0xff] %v2305_v0  ;;  %v3127_v0 = vrot.slane %v2101_v46, %v2084_v38  ;;  %v2459_v1 = vrot.slane %v1276_v44, %v2086_v39 }
  0x5e   :  { %3091 = vst [vmem:[#allocation18_spill] sm:$0xff] %v2309_v63  ;;  %3092 = vst [vmem:[#allocation19_spill] sm:$0xff] %v2312_v62  ;;  %v3125_v62 = vrot.slane %v2101_v46, %v2080_v36  ;;  %v3126_v63 = vrot.slane %v2101_v46, %v2082_v37 }
  0x5f   :  { %1807 = vset.pattern.permute.xlu1 %v1956_v18  ;;  %1816 = vset.pattern.permute.xlu0 %v1957_v19  ;;  %3129 = vst [vmem:[#allocation39_spill] sm:$0xff] %v2459_v1 }
  0x60   :  { %585 = vperm.xlu1 %1807, %v2033_v2   ;;  %884 = vperm.xlu0 %1816, %v2047_v13  }
  0x64   :  { %1809 = vset.pattern.permute.xlu1 %v1958_v20  ;;  %1818 = vset.pattern.permute.xlu0 %v1959_v21  ;;  %v2172_v20 = vld [vmem:[#allocation7 + $0x22] ss:$8 sm:$0xf] }
  0x65   :  { %663 = vperm.xlu1 %1809, %v2033_v2   ;;  %978 = vperm.xlu0 %1818, %v2033_v2  }
  0x69   :  { %1810 = vset.pattern.permute.xlu1 %v1953_v15  ;;  %1821 = vset.pattern.permute.xlu0 %v1960_v22  ;;  %v1972_v15 = vmov 27   ;;  %v845_v22 = vld [vmem:[#allocation7 + $0x43] ss:$8 sm:$0xf] }
  0x6a   :  { %702 = vperm.xlu1 %1810, %v2033_v2   ;;  %1143 = vperm.xlu0 %1821, %v2033_v2   ;;  %v2290_v6 = vrot.slane %v845_v22, %v2080_v36  ;;  %v2293_v5 = vrot.slane %v845_v22, %v2082_v37  ;;  %v2299_v4 = vrot.slane %v845_v22, %v2086_v39 }
  0x6c   :  { %3085 = vst [vmem:[#allocation12_spill] sm:$0xff] %v2290_v6  ;;  %3086 = vst [vmem:[#allocation13_spill] sm:$0xff] %v2293_v5 }
  0x6d   :  { %3088 = vst [vmem:[#allocation15_spill] sm:$0xff] %v2299_v4 }
  0x6e   :  { %1812 = vset.pattern.permute.xlu1 %v1961_v23  ;;  %1824 = vset.pattern.permute.xlu0 %v1962_v24  ;;  %v2201_v24 = vld [vmem:[#allocation7 + $0x25] ss:$8 sm:$0xf]  ;;  %v2211_v23 = vld [vmem:[#allocation7 + $0x26] ss:$8 sm:$0xf] }
  0x6f   :  { %758 = vperm.xlu1 %1812, %v2033_v2   ;;  %1221 = vperm.xlu0 %1824, %v2033_v2  }
  0x73   :  { %774 = vperm.xlu1 %1812, %v2047_v13   ;;  %1827 = vset.pattern.permute.xlu0 %v1963_v25 }
  0x74   :  { %1104 = vperm.xlu0 %1827, %v2047_v13  }
  0x77   :  { %1814 = vset.pattern.permute.xlu1 %v1955_v17 }
  0x78   :  { %829 = vperm.xlu1 %1814, %v2047_v13   ;;  %1829 = vset.pattern.permute.xlu0 %v1964_v26 }
  0x79   :  { %1354 = vperm.xlu0 %1829, %v2033_v2  }
  0x7c   :  { %1815 = vset.pattern.permute.xlu1 %v1957_v19 }
  0x7d   :  { %868 = vperm.xlu1 %1815, %v2033_v2   ;;  %1832 = vset.pattern.permute.xlu0 %v3044_v27 }
  0x7e   :  { %1425 = vperm.xlu0 %1832, %v2047_v13  }
  0x81   :  { %1817 = vset.pattern.permute.xlu1 %v1966_v28 }
  0x82   :  { %923 = vperm.xlu1 %1817, %v2033_v2   ;;  %1834 = vset.pattern.permute.xlu0 %v3043_v29  ;;  %v2296_v29 = vrot.slane %v845_v22, %v2084_v38 }
  0x83   :  { %1519 = vperm.xlu0 %1834, %v2033_v2  }
  0x84   :  { %3087 = vst [vmem:[#allocation14_spill] sm:$0xff] %v2296_v29 }
  0x86   :  { %939 = vperm.xlu1 %1817, %v2047_v13  }
  0x87   :  { %1837 = vset.pattern.permute.xlu0 %v3042_v30 }
  0x88   :  { %1590 = vperm.xlu0 %1837, %v2047_v13  }
  0x8a   :  { %1819 = vset.pattern.permute.xlu1 %v1969_v31 }
  0x8b   :  { %1033 = vperm.xlu1 %1819, %v2033_v2  }
  0x8c   :  { %1839 = vset.pattern.permute.xlu0 %v3041_v32  ;;  %v1973_v32 = vmov 28  }
  0x8d   :  { %1684 = vperm.xlu0 %1839, %v2033_v2  }
  0x8f   :  { %1820 = vset.pattern.permute.xlu1 %v1963_v25  ;;  %v2183_v25 = vld [vmem:[#allocation7 + $0x23] ss:$8 sm:$0xf] }
  0x90   :  { %1088 = vperm.xlu1 %1820, %v2033_v2  }
  0x94   :  { %1822 = vset.pattern.permute.xlu1 %v1971_v34  ;;  %v2191_v34 = vld [vmem:[#allocation7 + $0x24] ss:$8 sm:$0xf] }
  0x95   :  { %1182 = vperm.xlu1 %1822, %v2033_v2  }
  0x99   :  { %1823 = vset.pattern.permute.xlu1 %v1959_v21  ;;  %v790_v21 = vld [vmem:[#allocation7 + $0x42] ss:$8 sm:$0xf] }
  0x9a   :  { %994 = vperm.xlu1 %1823, %v2047_v13   ;;  %v2278_v10 = vrot.slane %v790_v21, %v2080_v36  ;;  %v2281_v30 = vrot.slane %v790_v21, %v2082_v37  ;;  %v2284_v9 = vrot.slane %v790_v21, %v2084_v38  ;;  %v2287_v7 = vrot.slane %v790_v21, %v2086_v39  ;;  %v1065_v21 = vld [vmem:[#allocation7 + $0x47] ss:$8 sm:$0xf] }
  0x9b   :  { %v2344_v52 = vrot.slane %v1065_v21, %v2080_v36  ;;  %v2352_v49 = vrot.slane %v1065_v21, %v2084_v38  ;;  %v2355_v48 = vrot.slane %v1065_v21, %v2086_v39 }
  0x9d   :  { %3103 = vst [vmem:[#allocation30_spill] sm:$0xff] %v2344_v52  ;;  %3106 = vst [vmem:[#allocation33_spill] sm:$0xff] %v2352_v49 }
  0x9e   :  { %1825 = vset.pattern.permute.xlu1 %v1969_v31  ;;  %v679_v31 = vld [vmem:[#allocation7 + $0x40] ss:$8 sm:$0xf]  ;;  %3107 = vst [vmem:[#allocation34_spill] sm:$0xff] %v2355_v48  ;;  %v3109_v48 = vmov 30  }
  0x9f   :  { %1049 = vperm.xlu1 %1825, %v2047_v13   ;;  %v2253_v17 = vrot.slane %v679_v31, %v2080_v36  ;;  %v2256_v28 = vrot.slane %v679_v31, %v2082_v37  ;;  %v2260_v18 = vrot.slane %v679_v31, %v2084_v38  ;;  %v2263_v33 = vrot.slane %v679_v31, %v2086_v39  ;;  %v955_v31 = vld [vmem:[#allocation7 + $0x45] ss:$8 sm:$0xf] }
  0xa0   :  { %v2315_v60 = vrot.slane %v955_v31, %v2080_v36  ;;  %v2318_v22 = vrot.slane %v955_v31, %v2082_v37  ;;  %v2324_v58 = vrot.slane %v955_v31, %v2084_v38 }
  0xa2   :  { %3093 = vst [vmem:[#allocation20_spill] sm:$0xff] %v2315_v60  ;;  %3094 = vst [vmem:[#allocation21_spill] sm:$0xff] %v2318_v22 }
  0xa3   :  { %1826 = vset.pattern.permute.xlu1 %v1972_v15  ;;  %3096 = vst [vmem:[#allocation23_spill] sm:$0xff] %v2324_v58  ;;  %v1974_v58 = vmov 31  }
  0xa4   :  { %1260 = vperm.xlu1 %1826, %v2033_v2  }
  0xa8   :  { %1828 = vset.pattern.permute.xlu1 %v1973_v32  ;;  %v735_v32 = vld [vmem:[#allocation7 + $0x41] ss:$8 sm:$0xf] }
  0xa9   :  { %1299 = vperm.xlu1 %1828, %v2033_v2   ;;  %v2266_v19 = vrot.slane %v735_v32, %v2080_v36  ;;  %v2269_v15 = vrot.slane %v735_v32, %v2082_v37  ;;  %v2272_v12 = vrot.slane %v735_v32, %v2084_v38  ;;  %v2275_v11 = vrot.slane %v735_v32, %v2086_v39  ;;  %v1010_v32 = vld [vmem:[#allocation7 + $0x46] ss:$8 sm:$0xf] }
  0xaa   :  { %v2330_v57 = vrot.slane %v1010_v32, %v2080_v36  ;;  %v2333_v16 = vrot.slane %v1010_v32, %v2082_v37  ;;  %v2338_v54 = vrot.slane %v1010_v32, %v2084_v38  ;;  %v2341_v53 = vrot.slane %v1010_v32, %v2086_v39 }
  0xab   :  { %v3114_v32 = vrot.slane %v2091_v41, %v2080_v36 }
  0xac   :  { %3098 = vst [vmem:[#allocation25_spill] sm:$0xff] %v2330_v57  ;;  %3099 = vst [vmem:[#allocation26_spill] sm:$0xff] %v2333_v16 }
  0xad   :  { %1315 = vperm.xlu1 %1828, %v2047_v13   ;;  %3101 = vst [vmem:[#allocation28_spill] sm:$0xff] %v2338_v54  ;;  %3102 = vst [vmem:[#allocation29_spill] sm:$0xff] %v2341_v53 }
  0xb1   :  { %1830 = vset.pattern.permute.xlu1 %v1964_v26  ;;  %v2327_v26 = vrot.slane %v955_v31, %v2086_v39  ;;  %v2347_v31 = vrot.slane %v1065_v21, %v2082_v37  ;;  %v3112_v21 = vrot.slane %v2088_v40, %v2084_v38 }
  0xb2   :  { %1370 = vperm.xlu1 %1830, %v2047_v13  }
  0xb3   :  { %3097 = vst [vmem:[#allocation24_spill] sm:$0xff] %v2327_v26  ;;  %3104 = vst [vmem:[#allocation31_spill] sm:$0xff] %v2347_v31  ;;  %v3111_v31 = vrot.slane %v2088_v40, %v2082_v37 }
  0xb6   :  { %1831 = vset.pattern.permute.xlu1 %v3109_v48 }
  0xb7   :  { %v157_v49 = vpop.permute.xlu1 %156  ;;  %1409 = vperm.xlu1 %1831, %v2033_v2   ;;  %v79_v27 = vpop.permute.xlu0 %78 }
  0xb8   :  { %v159_v55 = vsub.f32 %v3110_v43, %v157_v49  ;;  %v160_v52 = vsub.f32 %v3111_v31, %v157_v49  ;;  %v2398_v53 = vsub.f32 %v3112_v21, %v157_v49  ;;  %v2403_v48 = vsub.f32 %v3113_v47, %v157_v49 }
  0xb9   :  { %v81_v50 = vsub.f32 %v3114_v32, %v79_v27  ;;  %v3115_v43 = vrot.slane %v2091_v41, %v2082_v37  ;;  %v3116_v31 = vrot.slane %v2091_v41, %v2084_v38  ;;  %v3117_v21 = vrot.slane %v2091_v41, %v2086_v39 }
  0xba   :  { %v163_v59 = vand.u32 2147483647, %v159_v55  ;;  %v2422_v49 = vrot.slane %v1276_v44, %v2080_v36  ;;  %v164_v32 = vand.u32 2147483647, %v160_v52  ;;  %v2430_v47 = vrot.slane %v1276_v44, %v2084_v38 }
  0xbb   :  { %v82_v54 = vsub.f32 %v3115_v43, %v79_v27  ;;  %v83_v16 = vsub.f32 %v3116_v31, %v79_v27  ;;  %v84_v57 = vsub.f32 %v3117_v21, %v79_v27  ;;  %v85_v43 = vand.u32 2147483647, %v81_v50  ;;  %1833 = vset.pattern.permute.xlu1 %v1974_v58 }
  0xbc   :  { %3118 = vst [vmem:[#allocation36_spill] sm:$0xff] %v2422_v49  ;;  %v2425_v31 = vrot.slane %v1276_v44, %v2082_v37  ;;  %v165_v27 = vand.u32 2147483647, %v2398_v53  ;;  %v196_v21 = vpop.permute.xlu1 %195  ;;  %v118_v40 = vpop.permute.xlu0 %117  ;;  %1464 = vperm.xlu1 %1833, %v2033_v2   ;;  %3120 = vst [vmem:[#allocation38_spill] sm:$0xff] %v2430_v47  ;;  %v166_v52 = vand.u32 2147483647, %v2403_v48  ;;  %v3123_v49 = vrot.slane %v2093_v42, %v2084_v38 }
  0xbd   :  { %v86_v26 = vand.u32 2147483647, %v82_v54  ;;  %v87_v41 = vand.u32 2147483647, %v83_v16  ;;  %v88_v55 = vand.u32 2147483647, %v84_v57  ;;  %v3121_v54 = vrot.slane %v2093_v42, %v2080_v36 }
  0xbe   :  { %3119 = vst [vmem:[#allocation37_spill] sm:$0xff] %v2425_v31  ;;  %v89_v50 = vmax.f32 %v85_v43, 0.0  ;;  %v3122_v31 = vrot.slane %v2093_v42, %v2082_v37  ;;  %v200_v45 = vsub.f32 %v3123_v49, %v196_v21  ;;  %v3124_v47 = vrot.slane %v2093_v42, %v2086_v39 }
  0xbf   :  { %v198_v58 = vsub.f32 %v3121_v54, %v196_v21  ;;  %v90_v16 = vmax.f32 %v86_v26, 0.0  ;;  %v91_v57 = vmax.f32 %v87_v41, 0.0  ;;  %v92_v48 = vmax.f32 %v88_v55, 0.0 }
  0xc0   :  { %v199_v53 = vsub.f32 %v3122_v31, %v196_v21  ;;  %v201_v22 = vsub.f32 %v3124_v47, %v196_v21  ;;  %v120_v54 = vsub.f32 %v3125_v62, %v118_v40  ;;  %v121_v31 = vsub.f32 %v3126_v63, %v118_v40  ;;  %1480 = vperm.xlu1 %1833, %v2047_v13  }
  0xc1   :  { %v202_v43 = vand.u32 2147483647, %v198_v58  ;;  %v204_v41 = vand.u32 2147483647, %v200_v45  ;;  %v122_v49 = vsub.f32 %v3127_v0, %v118_v40  ;;  %v3128_v42 = vrot.slane %v2101_v46, %v2086_v39  ;;  %v235_v62 = vpop.permute.xlu1 %234 }
  0xc2   :  { %v203_v26 = vand.u32 2147483647, %v199_v53  ;;  %v205_v55 = vand.u32 2147483647, %v201_v22  ;;  %v124_v21 = vand.u32 2147483647, %v120_v54  ;;  %v3130_v45 = vrot.slane %v2111_v51, %v2080_v36 }
  0xc3   :  { %v123_v47 = vsub.f32 %v3128_v42, %v118_v40  ;;  %v125_v58 = vand.u32 2147483647, %v121_v31  ;;  %v126_v63 = vand.u32 2147483647, %v122_v49  ;;  %v3131_v0 = vrot.slane %v2111_v51, %v2082_v37  ;;  %v274_v49 = vpop.permute.xlu0 %273 }
  0xc4   :  { %v237_v60 = vsub.f32 %v3130_v45, %v235_v62  ;;  %v128_v40 = vmax.f32 %v89_v50, %v124_v21  ;;  %v3132_v22 = vrot.slane %v2111_v51, %v2084_v38  ;;  %v3133_v44 = vrot.slane %v2111_v51, %v2086_v39 }
  0xc5   :  { %v127_v53 = vand.u32 2147483647, %v123_v47  ;;  %v238_v46 = vsub.f32 %v3131_v0, %v235_v62  ;;  %v129_v42 = vmax.f32 %v90_v16, %v125_v58  ;;  %v130_v47 = vmax.f32 %v91_v57, %v126_v63 }
  0xc6   :  { %v239_v54 = vsub.f32 %v3132_v22, %v235_v62  ;;  %v240_v31 = vsub.f32 %v3133_v44, %v235_v62  ;;  %v241_v4 = vand.u32 2147483647, %v237_v60  ;;  %v3134_v45 = vmov 32   ;;  %v313_v60 = vpop.permute.xlu1 %312 }
  0xc7   :  { %v131_v1 = vmax.f32 %v92_v48, %v127_v53  ;;  %v242_v29 = vand.u32 2147483647, %v238_v46  ;;  %1835 = vset.pattern.permute.xlu1 %v3134_v45  ;;  %v167_v5 = vmax.f32 %v128_v40, %v163_v59  ;;  %v168_v6 = vmax.f32 %v129_v42, %v164_v32 }
  0xc8   :  { %v243_v0 = vand.u32 2147483647, %v239_v54  ;;  %v244_v50 = vand.u32 2147483647, %v240_v31  ;;  %1535 = vperm.xlu1 %1835, %v2047_v13   ;;  %v169_v16 = vmax.f32 %v130_v47, %v165_v27  ;;  %v3135_v58 = vrot.slane %v2121_v56, %v2080_v36 }
  0xc9   :  { %v170_v21 = vmax.f32 %v131_v1, %v166_v52  ;;  %v3136_v57 = vrot.slane %v2121_v56, %v2082_v37  ;;  %v206_v62 = vmax.f32 %v167_v5, %v202_v43  ;;  %v207_v63 = vmax.f32 %v168_v6, %v203_v26 }
  0xca   :  { %v276_v51 = vsub.f32 %v3135_v58, %v274_v49  ;;  %v3137_v59 = vrot.slane %v2121_v56, %v2084_v38  ;;  %v3138_v53 = vrot.slane %v2121_v56, %v2086_v39  ;;  %v208_v1 = vmax.f32 %v169_v16, %v204_v41 }
  0xcb   :  { %v277_v48 = vsub.f32 %v3136_v57, %v274_v49  ;;  %v209_v52 = vmax.f32 %v170_v21, %v205_v55  ;;  %v245_v42 = vmax.f32 %v206_v62, %v241_v4  ;;  %v246_v22 = vmax.f32 %v207_v63, %v242_v29 }
  0xcc   :  { %v278_v32 = vsub.f32 %v3137_v59, %v274_v49  ;;  %v279_v27 = vsub.f32 %v3138_v53, %v274_v49  ;;  %v280_v46 = vand.u32 2147483647, %v276_v51  ;;  %v3139_v31 = vmov 33  }
  0xcd   :  { %v281_v40 = vand.u32 2147483647, %v277_v48  ;;  %1836 = vset.pattern.permute.xlu1 %v3139_v31  ;;  %v247_v5 = vmax.f32 %v208_v1, %v243_v0  ;;  %v248_v6 = vmax.f32 %v209_v52, %v244_v50  ;;  %v3140_v43 = vrot.slane %v2132_v61, %v2080_v36  ;;  %v352_v0 = vpop.permute.xlu1 %351 }
  0xce   :  { %v282_v54 = vand.u32 2147483647, %v278_v32  ;;  %v283_v44 = vand.u32 2147483647, %v279_v27  ;;  %v3141_v56 = vrot.slane %v2132_v61, %v2082_v37  ;;  %1574 = vperm.xlu1 %1836, %v2033_v2   ;;  %v284_v41 = vmax.f32 %v245_v42, %v280_v46  ;;  %v391_v32 = vpop.permute.xlu0 %390 }
  0xcf   :  { %v315_v26 = vsub.f32 %v3140_v43, %v313_v60  ;;  %v285_v55 = vmax.f32 %v246_v22, %v281_v40  ;;  %v3142_v29 = vrot.slane %v2132_v61, %v2084_v38  ;;  %v3143_v47 = vrot.slane %v2132_v61, %v2086_v39 }
  0xd0   :  { %v316_v49 = vsub.f32 %v3141_v56, %v313_v60  ;;  %v286_v50 = vmax.f32 %v247_v5, %v282_v54  ;;  %v287_v16 = vmax.f32 %v248_v6, %v283_v44  ;;  %v3144_v48 = vrot.slane %v2142_v3, %v2080_v36 }
  0xd1   :  { %v317_v4 = vsub.f32 %v3142_v29, %v313_v60  ;;  %v318_v45 = vsub.f32 %v3143_v47, %v313_v60  ;;  %v319_v21 = vand.u32 2147483647, %v315_v26  ;;  %v3145_v63 = vrot.slane %v2142_v3, %v2082_v37 }
  0xd2   :  { %v320_v58 = vand.u32 2147483647, %v316_v49  ;;  %v354_v62 = vsub.f32 %v3144_v48, %v352_v0  ;;  %v3146_v61 = vrot.slane %v2142_v3, %v2084_v38  ;;  %v3147_v1 = vrot.slane %v2142_v3, %v2086_v39  ;;  %v430_v3 = vpop.permute.xlu1 %429 }
  0xd3   :  { %v321_v51 = vand.u32 2147483647, %v317_v4  ;;  %v322_v57 = vand.u32 2147483647, %v318_v45  ;;  %v355_v59 = vsub.f32 %v3145_v63, %v352_v0  ;;  %v323_v53 = vmax.f32 %v284_v41, %v319_v21 }
  0xd4   :  { %v324_v27 = vmax.f32 %v285_v55, %v320_v58  ;;  %v356_v60 = vsub.f32 %v3146_v61, %v352_v0  ;;  %v357_v52 = vsub.f32 %v3147_v1, %v352_v0  ;;  %v1975_v46 = vmov 34  }
  0xd5   :  { %1838 = vset.pattern.permute.xlu1 %v1975_v46  ;;  %v325_v40 = vmax.f32 %v286_v50, %v321_v51  ;;  %v326_v42 = vmax.f32 %v287_v16, %v322_v57  ;;  %v358_v22 = vand.u32 2147483647, %v354_v62  ;;  %v359_v54 = vand.u32 2147483647, %v355_v59 }
  0xd6   :  { %1629 = vperm.xlu1 %1838, %v2033_v2   ;;  %v360_v44 = vand.u32 2147483647, %v356_v60  ;;  %v361_v31 = vand.u32 2147483647, %v357_v52  ;;  %v3148_v5 = vrot.slane %v2152_v8, %v2080_v36  ;;  %v3149_v43 = vrot.slane %v2152_v8, %v2082_v37  ;;  %v469_v1 = vpop.permute.xlu1 %468 }
  0xd7   :  { %v362_v56 = vmax.f32 %v323_v53, %v358_v22  ;;  %v363_v49 = vmax.f32 %v324_v27, %v359_v54  ;;  %v3150_v41 = vrot.slane %v2152_v8, %v2084_v38  ;;  %v3151_v2 = vrot.slane %v2152_v8, %v2086_v39 }
  0xd8   :  { %v393_v6 = vsub.f32 %v3148_v5, %v391_v32  ;;  %v394_v26 = vsub.f32 %v3149_v43, %v391_v32  ;;  %v364_v4 = vmax.f32 %v325_v40, %v360_v44  ;;  %v365_v47 = vmax.f32 %v326_v42, %v361_v31  ;;  %v508_v44 = vpop.permute.xlu0 %507 }
  0xd9   :  { %v395_v55 = vsub.f32 %v3150_v41, %v391_v32  ;;  %v396_v29 = vsub.f32 %v3151_v2, %v391_v32  ;;  %v3152_v21 = vrot.slane %v2162_v14, %v2080_v36  ;;  %v3153_v51 = vrot.slane %v2162_v14, %v2082_v37 }
  0xda   :  { %v397_v45 = vand.u32 2147483647, %v393_v6  ;;  %v398_v0 = vand.u32 2147483647, %v394_v26  ;;  %1645 = vperm.xlu1 %1838, %v2047_v13   ;;  %v3154_v8 = vrot.slane %v2162_v14, %v2084_v38  ;;  %v3155_v59 = vrot.slane %v2162_v14, %v2086_v39 }
  0xdb   :  { %v399_v50 = vand.u32 2147483647, %v395_v55  ;;  %v400_v16 = vand.u32 2147483647, %v396_v29  ;;  %v432_v58 = vsub.f32 %v3152_v21, %v430_v3  ;;  %v433_v57 = vsub.f32 %v3153_v51, %v430_v3  ;;  %v547_v51 = vpop.permute.xlu1 %546 }
  0xdc   :  { %v401_v48 = vmax.f32 %v362_v56, %v397_v45  ;;  %v402_v62 = vmax.f32 %v363_v49, %v398_v0  ;;  %v434_v63 = vsub.f32 %v3154_v8, %v430_v3  ;;  %v435_v32 = vsub.f32 %v3155_v59, %v430_v3 }
  0xdd   :  { %v403_v53 = vmax.f32 %v364_v4, %v399_v50  ;;  %v404_v27 = vmax.f32 %v365_v47, %v400_v16  ;;  %v436_v61 = vand.u32 2147483647, %v432_v58  ;;  %v437_v60 = vand.u32 2147483647, %v433_v57 }
  0xde   :  { %v438_v52 = vand.u32 2147483647, %v434_v63  ;;  %v439_v46 = vand.u32 2147483647, %v435_v32  ;;  %v3156_v40 = vrot.slane %v2172_v20, %v2080_v36  ;;  %v3157_v22 = vrot.slane %v2172_v20, %v2082_v37 }
  0xdf   :  { %v440_v31 = vmax.f32 %v401_v48, %v436_v61  ;;  %v441_v5 = vmax.f32 %v402_v62, %v437_v60  ;;  %v3158_v14 = vrot.slane %v2172_v20, %v2084_v38  ;;  %v3159_v43 = vrot.slane %v2172_v20, %v2086_v39  ;;  %v1331_v57 = vld [vmem:[#allocation7 + $0x65] ss:$8 sm:$0xf] }
  0xe0   :  { %v471_v42 = vsub.f32 %v3156_v40, %v469_v1  ;;  %v472_v54 = vsub.f32 %v3157_v22, %v469_v1  ;;  %v3160_v3 = vmov 35   ;;  %v442_v56 = vmax.f32 %v403_v53, %v438_v52 }
  0xe1   :  { %v473_v6 = vsub.f32 %v3158_v14, %v469_v1  ;;  %v474_v26 = vsub.f32 %v3159_v43, %v469_v1  ;;  %1840 = vset.pattern.permute.xlu1 %v3160_v3  ;;  %v443_v49 = vmax.f32 %v404_v27, %v439_v46  ;;  %v3161_v4 = vrot.slane %v2183_v25, %v2080_v36  ;;  %v625_v1 = vpop.permute.xlu0 %624 }
  0xe2   :  { %v475_v41 = vand.u32 2147483647, %v471_v42  ;;  %v476_v55 = vand.u32 2147483647, %v472_v54  ;;  %1700 = vperm.xlu1 %1840, %v2047_v13   ;;  %v3162_v45 = vrot.slane %v2183_v25, %v2082_v37  ;;  %v3163_v16 = vrot.slane %v2183_v25, %v2084_v38 }
  0xe3   :  { %v477_v2 = vand.u32 2147483647, %v473_v6  ;;  %v478_v29 = vand.u32 2147483647, %v474_v26  ;;  %v510_v47 = vsub.f32 %v3161_v4, %v508_v44  ;;  %v3164_v58 = vrot.slane %v2183_v25, %v2086_v39  ;;  %v586_v26 = vpop.permute.xlu1 %585 }
  0xe4   :  { %v511_v0 = vsub.f32 %v3162_v45, %v508_v44  ;;  %v479_v20 = vmax.f32 %v440_v31, %v475_v41  ;;  %v480_v50 = vmax.f32 %v441_v5, %v476_v55  ;;  %v512_v21 = vsub.f32 %v3163_v16, %v508_v44 }
  0xe5   :  { %v513_v13 = vsub.f32 %v3164_v58, %v508_v44  ;;  %v481_v48 = vmax.f32 %v442_v56, %v477_v2  ;;  %v482_v62 = vmax.f32 %v443_v49, %v478_v29  ;;  %v514_v8 = vand.u32 2147483647, %v510_v47 }
  0xe6   :  { %v515_v63 = vand.u32 2147483647, %v511_v0  ;;  %v516_v59 = vand.u32 2147483647, %v512_v21  ;;  %v3165_v53 = vrot.slane %v2191_v34, %v2080_v36  ;;  %v3166_v61 = vrot.slane %v2191_v34, %v2082_v37 }
  0xe7   :  { %v517_v32 = vand.u32 2147483647, %v513_v13  ;;  %v518_v52 = vmax.f32 %v479_v20, %v514_v8  ;;  %v3167_v46 = vrot.slane %v2191_v34, %v2084_v38  ;;  %v3168_v42 = vrot.slane %v2191_v34, %v2086_v39  ;;  %v1386_v8 = vld [vmem:[#allocation7 + $0x66] ss:$8 sm:$0xf] }
  0xe8   :  { %v549_v27 = vsub.f32 %v3165_v53, %v547_v51  ;;  %v550_v60 = vsub.f32 %v3166_v61, %v547_v51  ;;  %v519_v25 = vmax.f32 %v480_v50, %v515_v63  ;;  %v520_v54 = vmax.f32 %v481_v48, %v516_v59 }
  0xe9   :  { %v551_v40 = vsub.f32 %v3167_v46, %v547_v51  ;;  %v552_v22 = vsub.f32 %v3168_v42, %v547_v51  ;;  %v2578_v5 = vrot.slane %v1331_v57, %v2080_v36  ;;  %v521_v14 = vmax.f32 %v482_v62, %v517_v32 }
  0xea   :  { %v553_v44 = vand.u32 2147483647, %v549_v27  ;;  %v554_v31 = vand.u32 2147483647, %v550_v60  ;;  %v3169_v3 = vrot.slane %v2211_v23, %v2080_v36  ;;  %v3170_v41 = vrot.slane %v2201_v24, %v2080_v36 }
  0xeb   :  { %v555_v6 = vand.u32 2147483647, %v551_v40  ;;  %v556_v43 = vand.u32 2147483647, %v552_v22  ;;  %v3171_v55 = vrot.slane %v2201_v24, %v2082_v37  ;;  %v3172_v29 = vrot.slane %v2211_v23, %v2082_v37 }
  0xec   :  { %v627_v56 = vsub.f32 %v3169_v3, %v625_v1  ;;  %v557_v49 = vmax.f32 %v518_v52, %v553_v44  ;;  %v588_v34 = vsub.f32 %v3170_v41, %v586_v26  ;;  %v558_v47 = vmax.f32 %v519_v25, %v554_v31  ;;  %v664_v52 = vpop.permute.xlu1 %663  ;;  %v720_v31 = vpop.permute.xlu0 %719 }
  0xed   :  { %v589_v2 = vsub.f32 %v3171_v55, %v586_v26  ;;  %v628_v4 = vsub.f32 %v3172_v29, %v625_v1  ;;  %v559_v45 = vmax.f32 %v520_v54, %v555_v6  ;;  %v3173_v0 = vrot.slane %v2201_v24, %v2084_v38  ;;  %v2632_v29 = vld [vmem:[#allocation7 + $0x67] ss:$8 sm:$0xf] }
  0xee   :  { %v3174_v50 = vrot.slane %v2201_v24, %v2086_v39  ;;  %v592_v21 = vand.u32 2147483647, %v588_v34  ;;  %v3175_v13 = vrot.slane %v2211_v23, %v2084_v38  ;;  %v3176_v48 = vrot.slane %v2211_v23, %v2086_v39  ;;  %3183 = vst [vmem:[#allocation42_spill] sm:$0xff] %v2632_v29 }
  0xef   :  { %v590_v20 = vsub.f32 %v3173_v0, %v586_v26  ;;  %v593_v58 = vand.u32 2147483647, %v589_v2  ;;  %v560_v63 = vmax.f32 %v521_v14, %v556_v43  ;;  %v631_v53 = vand.u32 2147483647, %v627_v56 }
  0xf0   :  { %v591_v16 = vsub.f32 %v3174_v50, %v586_v26  ;;  %v629_v51 = vsub.f32 %v3175_v13, %v625_v1  ;;  %v630_v62 = vsub.f32 %v3176_v48, %v625_v1  ;;  %v596_v27 = vmax.f32 %v557_v49, %v592_v21  ;;  %v703_v0 = vpop.permute.xlu1 %702 }
  0xf1   :  { %v594_v59 = vand.u32 2147483647, %v590_v20  ;;  %v597_v61 = vmax.f32 %v558_v47, %v593_v58  ;;  %v632_v60 = vand.u32 2147483647, %v628_v4  ;;  %v3177_v42 = vrot.slane %v2221_v35, %v2080_v36 }
  0xf2   :  { %v595_v32 = vand.u32 2147483647, %v591_v16  ;;  %v633_v24 = vand.u32 2147483647, %v629_v51  ;;  %v634_v40 = vand.u32 2147483647, %v630_v62  ;;  %v3178_v23 = vrot.slane %v2221_v35, %v2082_v37  ;;  %v814_v62 = vpop.permute.xlu0 %813 }
  0xf3   :  { %v598_v25 = vmax.f32 %v559_v45, %v594_v59  ;;  %v666_v22 = vsub.f32 %v3177_v42, %v664_v52  ;;  %v3179_v54 = vrot.slane %v2221_v35, %v2084_v38  ;;  %v2614_v14 = vrot.slane %v1331_v57, %v2082_v37 }
  0xf4   :  { %v599_v46 = vmax.f32 %v560_v63, %v595_v32  ;;  %v667_v1 = vsub.f32 %v3178_v23, %v664_v52  ;;  %v2617_v6 = vrot.slane %v1331_v57, %v2084_v38  ;;  %v3180_v43 = vrot.slane %v2221_v35, %v2086_v39 }
  0xf5   :  { %v668_v44 = vsub.f32 %v3179_v54, %v664_v52  ;;  %v2623_v3 = vrot.slane %v1331_v57, %v2086_v39  ;;  %v2626_v56 = vrot.slane %v1386_v8, %v2080_v36  ;;  %v2629_v49 = vrot.slane %v1386_v8, %v2082_v37 }
  0xf6   :  { %v669_v26 = vsub.f32 %v3180_v43, %v664_v52  ;;  %v635_v41 = vmax.f32 %v596_v27, %v631_v53  ;;  %v636_v34 = vmax.f32 %v597_v61, %v632_v60  ;;  %v670_v55 = vand.u32 2147483647, %v666_v22 }
  0xf7   :  { %3181 = vst [vmem:[#allocation40_spill] sm:$0xff] %v2626_v56  ;;  %3182 = vst [vmem:[#allocation41_spill] sm:$0xff] %v2629_v49  ;;  %v722_v2 = vsub.f32 %v2253_v17, %v720_v31  ;;  %v637_v4 = vmax.f32 %v598_v25, %v633_v24  ;;  %v638_v47 = vmax.f32 %v599_v46, %v634_v40  ;;  %v671_v35 = vand.u32 2147483647, %v667_v1 }
  0xf8   :  { %v672_v45 = vand.u32 2147483647, %v668_v44  ;;  %v673_v57 = vand.u32 2147483647, %v669_v26  ;;  %v705_v20 = vsub.f32 %v2253_v17, %v703_v0  ;;  %v706_v50 = vsub.f32 %v2256_v28, %v703_v0 }
  0xf9   :  { %v723_v16 = vsub.f32 %v2256_v28, %v720_v31  ;;  %v707_v21 = vsub.f32 %v2260_v18, %v703_v0  ;;  %v708_v58 = vsub.f32 %v2263_v33, %v703_v0  ;;  %v724_v13 = vsub.f32 %v2260_v18, %v720_v31 }
  0xfa   :  { %v2641_v51 = vrot.slane %v1386_v8, %v2084_v38  ;;  %v674_v48 = vmax.f32 %v635_v41, %v670_v55  ;;  %v2644_v63 = vrot.slane %v1386_v8, %v2086_v39  ;;  %v2648_v17 = vrot.slane %v2632_v29, %v2080_v36  ;;  %v759_v8 = vpop.permute.xlu1 %758 }
  0xfb   :  { %v2652_v28 = vrot.slane %v2632_v29, %v2082_v37  ;;  %v675_v59 = vmax.f32 %v636_v34, %v671_v35  ;;  %v709_v32 = vand.u32 2147483647, %v705_v20  ;;  %v725_v18 = vsub.f32 %v2263_v33, %v720_v31 }
  0xfc   :  { %3184 = vst [vmem:[#allocation43_spill] sm:$0xff] %v2641_v51  ;;  %3185 = vst [vmem:[#allocation44_spill] sm:$0xff] %v2644_v63  ;;  %v726_v53 = vand.u32 2147483647, %v722_v2  ;;  %v676_v27 = vmax.f32 %v637_v4, %v672_v45  ;;  %v677_v61 = vmax.f32 %v638_v47, %v673_v57  ;;  %v710_v60 = vand.u32 2147483647, %v706_v50 }
  0xfd   :  { %3186 = vst [vmem:[#allocation45_spill] sm:$0xff] %v2648_v17  ;;  %3187 = vst [vmem:[#allocation46_spill] sm:$0xff] %v2652_v28  ;;  %v2655_v24 = vand.u32 2147483647, %v723_v16  ;;  %v711_v52 = vand.u32 2147483647, %v707_v21  ;;  %v816_v40 = vsub.f32 %v2278_v10, %v814_v62  ;;  %v761_v42 = vsub.f32 %v2266_v19, %v759_v8 }
  0xfe   :  { %v712_v25 = vand.u32 2147483647, %v708_v58  ;;  %v2657_v46 = vand.u32 2147483647, %v724_v13  ;;  %v762_v22 = vsub.f32 %v2269_v15, %v759_v8  ;;  %v763_v23 = vsub.f32 %v2272_v12, %v759_v8  ;;  %v775_v55 = vpop.permute.xlu1 %774 }
  0xff   :  { %v764_v33 = vsub.f32 %v2275_v11, %v759_v8  ;;  %v713_v1 = vmax.f32 %v674_v48, %v709_v32  ;;  %v729_v54 = vand.u32 2147483647, %v725_v18  ;;  %v817_v44 = vsub.f32 %v2281_v30, %v814_v62  ;;  %v885_v32 = vpop.permute.xlu0 %884 }
 0x100   :  { %v818_v31 = vsub.f32 %v2284_v9, %v814_v62  ;;  %v714_v43 = vmax.f32 %v675_v59, %v710_v60  ;;  %v765_v26 = vand.u32 2147483647, %v761_v42  ;;  %v766_v41 = vand.u32 2147483647, %v762_v22 }
 0x101   :  { %v767_v34 = vand.u32 2147483647, %v763_v23  ;;  %v730_v2 = vmax.f32 %v726_v53, 0.0  ;;  %v731_v4 = vmax.f32 %v2655_v24, 0.0  ;;  %v768_v47 = vand.u32 2147483647, %v764_v33 }
 0x102   :  { %v819_v35 = vsub.f32 %v2287_v7, %v814_v62  ;;  %v715_v45 = vmax.f32 %v676_v27, %v711_v52  ;;  %v716_v0 = vmax.f32 %v677_v61, %v712_v25  ;;  %v2668_v57 = vand.u32 2147483647, %v816_v40  ;;  %v830_v61 = vpop.permute.xlu1 %829  ;;  %v3188_v25 = vld [vmem:[#allocation12_spill] sm:$0xff]  ;;  %v3189_v33 = vld [vmem:[#allocation13_spill] sm:$0xff] }
 0x103   :  { %v777_v20 = vsub.f32 %v2266_v19, %v775_v55  ;;  %v2671_v50 = vmax.f32 %v713_v1, %v765_v26  ;;  %v2673_v16 = vand.u32 2147483647, %v817_v44  ;;  %v2675_v21 = vand.u32 2147483647, %v818_v31  ;;  %v3190_v31 = vld [vmem:[#allocation14_spill] sm:$0xff] }
 0x104   :  { %v778_v58 = vsub.f32 %v2269_v15, %v775_v55  ;;  %v2678_v13 = vmax.f32 %v714_v43, %v766_v41  ;;  %v2680_v48 = vmax.f32 %v715_v45, %v767_v34  ;;  %v779_v62 = vsub.f32 %v2272_v12, %v775_v55  ;;  %v3191_v34 = vld [vmem:[#allocation15_spill] sm:$0xff] }
 0x105   :  { %v780_v59 = vsub.f32 %v2275_v11, %v775_v55  ;;  %v732_v18 = vmax.f32 %v2657_v46, 0.0  ;;  %v733_v19 = vmax.f32 %v729_v54, 0.0  ;;  %v2685_v53 = vmax.f32 %v716_v0, %v768_v47 }
 0x106   :  { %v2687_v27 = vand.u32 2147483647, %v819_v35  ;;  %v781_v60 = vand.u32 2147483647, %v777_v20  ;;  %v832_v15 = vsub.f32 %v2278_v10, %v830_v61  ;;  %v833_v24 = vsub.f32 %v2281_v30, %v830_v61  ;;  %v869_v26 = vpop.permute.xlu1 %868 }
 0x107   :  { %v834_v8 = vsub.f32 %v2284_v9, %v830_v61  ;;  %v824_v12 = vmax.f32 %v2671_v50, %v2668_v57  ;;  %v782_v11 = vand.u32 2147483647, %v778_v58  ;;  %v835_v52 = vsub.f32 %v2287_v7, %v830_v61  ;;  %v979_v50 = vpop.permute.xlu0 %978  ;;  %v3192_v61 = vld [vmem:[#allocation20_spill] sm:$0xff] }
 0x108   :  { %v887_v46 = vsub.f32 %v3188_v25, %v885_v32  ;;  %v825_v40 = vmax.f32 %v2678_v13, %v2673_v16  ;;  %v826_v42 = vmax.f32 %v2680_v48, %v2675_v21  ;;  %v783_v22 = vand.u32 2147483647, %v779_v62 }
 0x109   :  { %v784_v10 = vand.u32 2147483647, %v780_v59  ;;  %v827_v30 = vmax.f32 %v2685_v53, %v2687_v27  ;;  %v836_v9 = vand.u32 2147483647, %v832_v15  ;;  %v837_v23 = vand.u32 2147483647, %v833_v24 }
 0x10a   :  { %v888_v1 = vsub.f32 %v3189_v33, %v885_v32  ;;  %v785_v54 = vmax.f32 %v730_v2, %v781_v60  ;;  %v838_v44 = vand.u32 2147483647, %v834_v8  ;;  %v839_v7 = vand.u32 2147483647, %v835_v52  ;;  %v924_v27 = vpop.permute.xlu1 %923  ;;  %v3193_v60 = vld [vmem:[#allocation16_spill] sm:$0xff]  ;;  %v3194_v24 = vld [vmem:[#allocation17_spill] sm:$0xff] }
 0x10b   :  { %v889_v43 = vsub.f32 %v3190_v31, %v885_v32  ;;  %v786_v41 = vmax.f32 %v731_v4, %v782_v11  ;;  %v890_v55 = vsub.f32 %v3191_v34, %v885_v32  ;;  %v871_v47 = vsub.f32 %v3188_v25, %v869_v26  ;;  %v3195_v11 = vld [vmem:[#allocation18_spill] sm:$0xff] }
 0x10c   :  { %v872_v35 = vsub.f32 %v3189_v33, %v869_v26  ;;  %v787_v45 = vmax.f32 %v732_v18, %v783_v22  ;;  %v788_v0 = vmax.f32 %v733_v19, %v784_v10  ;;  %v891_v57 = vand.u32 2147483647, %v887_v46  ;;  %v3196_v46 = vld [vmem:[#allocation19_spill] sm:$0xff]  ;;  %v3197_v10 = vld [vmem:[#allocation21_spill] sm:$0xff] }
 0x10d   :  { %v873_v20 = vsub.f32 %v3190_v31, %v869_v26  ;;  %v840_v16 = vmax.f32 %v785_v54, %v836_v9  ;;  %v841_v2 = vmax.f32 %v786_v41, %v837_v23  ;;  %v892_v21 = vand.u32 2147483647, %v888_v1  ;;  %v3198_v23 = vld [vmem:[#allocation23_spill] sm:$0xff] }
 0x10e   :  { %v874_v58 = vsub.f32 %v3191_v34, %v869_v26  ;;  %v842_v13 = vmax.f32 %v787_v45, %v838_v44  ;;  %v843_v48 = vmax.f32 %v788_v0, %v839_v7  ;;  %v893_v4 = vand.u32 2147483647, %v889_v43  ;;  %v3199_v7 = vld [vmem:[#allocation24_spill] sm:$0xff] }
 0x10f   :  { %v875_v62 = vand.u32 2147483647, %v871_v47  ;;  %v894_v59 = vand.u32 2147483647, %v890_v55  ;;  %v876_v32 = vand.u32 2147483647, %v872_v35  ;;  %v981_v18 = vsub.f32 %v3192_v61, %v979_v50  ;;  %v940_v55 = vpop.permute.xlu1 %939 }
 0x110   :  { %v877_v53 = vand.u32 2147483647, %v873_v20  ;;  %v878_v19 = vand.u32 2147483647, %v874_v58  ;;  %v926_v15 = vsub.f32 %v3193_v60, %v924_v27  ;;  %v927_v8 = vsub.f32 %v3194_v24, %v924_v27  ;;  %v1144_v58 = vpop.permute.xlu0 %1143 }
 0x111   :  { %v928_v52 = vsub.f32 %v3195_v11, %v924_v27  ;;  %v2713_v25 = vmax.f32 %v840_v16, %v891_v57  ;;  %v929_v22 = vsub.f32 %v3196_v46, %v924_v27  ;;  %v982_v9 = vsub.f32 %v3197_v10, %v979_v50 }
 0x112   :  { %v983_v33 = vsub.f32 %v3198_v23, %v979_v50  ;;  %v879_v1 = vmax.f32 %v824_v12, %v875_v62  ;;  %v930_v54 = vand.u32 2147483647, %v926_v15  ;;  %v931_v44 = vand.u32 2147483647, %v927_v8  ;;  %v3200_v15 = vld [vmem:[#allocation22_spill] sm:$0xff] }
 0x113   :  { %v984_v31 = vsub.f32 %v3199_v7, %v979_v50  ;;  %v880_v43 = vmax.f32 %v825_v40, %v876_v32  ;;  %v881_v26 = vmax.f32 %v826_v42, %v877_v53  ;;  %v932_v41 = vand.u32 2147483647, %v928_v52  ;;  %v3203_v52 = vld [vmem:[#allocation25_spill] sm:$0xff] }
 0x114   :  { %v933_v34 = vand.u32 2147483647, %v929_v22  ;;  %v882_v47 = vmax.f32 %v827_v30, %v878_v19  ;;  %v934_v35 = vmax.f32 %v879_v1, %v930_v54  ;;  %v985_v45 = vand.u32 2147483647, %v981_v18  ;;  %v3204_v22 = vld [vmem:[#allocation26_spill] sm:$0xff] }
 0x115   :  { %v942_v0 = vsub.f32 %v3193_v60, %v940_v55  ;;  %v935_v57 = vmax.f32 %v880_v43, %v931_v44  ;;  %v986_v20 = vand.u32 2147483647, %v982_v9  ;;  %v943_v16 = vsub.f32 %v3194_v24, %v940_v55  ;;  %v1034_v60 = vpop.permute.xlu1 %1033 }
 0x116   :  { %v944_v12 = vsub.f32 %v3195_v11, %v940_v55  ;;  %v2722_v62 = vmax.f32 %v841_v2, %v892_v21  ;;  %v2724_v50 = vmax.f32 %v842_v13, %v893_v4  ;;  %v987_v40 = vand.u32 2147483647, %v983_v33  ;;  %v3206_v33 = vld [vmem:[#allocation29_spill] sm:$0xff] }
 0x117   :  { %v988_v42 = vand.u32 2147483647, %v984_v31  ;;  %v936_v32 = vmax.f32 %v881_v26, %v932_v41  ;;  %v937_v53 = vmax.f32 %v882_v47, %v933_v34  ;;  %v945_v30 = vsub.f32 %v3196_v46, %v940_v55  ;;  %v1222_v34 = vpop.permute.xlu0 %1221 }
 0x118   :  { %v2727_v27 = vand.u32 2147483647, %v942_v0  ;;  %v2729_v18 = vmax.f32 %v843_v48, %v894_v59  ;;  %v989_v19 = vmax.f32 %v934_v35, %v985_v45  ;;  %v3201_v24 = vrot.slane %v3200_v15, %v2080_v36  ;;  %v3205_v59 = vld [vmem:[#allocation28_spill] sm:$0xff] }
 0x119   :  { %v3202_v2 = vrot.slane %v3200_v15, %v2082_v37  ;;  %v990_v13 = vmax.f32 %v935_v57, %v986_v20  ;;  %v2737_v4 = vand.u32 2147483647, %v943_v16  ;;  %v2739_v11 = vand.u32 2147483647, %v944_v12  ;;  %v1089_v12 = vpop.permute.xlu1 %1088 }
 0x11a   :  { %v1146_v8 = vsub.f32 %v3201_v24, %v1144_v58  ;;  %v1036_v46 = vsub.f32 %v3203_v52, %v1034_v60  ;;  %v1037_v48 = vsub.f32 %v3204_v22, %v1034_v60  ;;  %v1038_v9 = vsub.f32 %v3205_v59, %v1034_v60 }
 0x11b   :  { %v1147_v21 = vsub.f32 %v3202_v2, %v1144_v58  ;;  %v1039_v1 = vsub.f32 %v3206_v33, %v1034_v60  ;;  %v3207_v54 = vrot.slane %v3200_v15, %v2084_v38  ;;  %v991_v31 = vmax.f32 %v936_v32, %v987_v40  ;;  %v3210_v60 = vld [vmem:[#allocation32_spill] sm:$0xff] }
 0x11c   :  { %v992_v43 = vmax.f32 %v937_v53, %v988_v42  ;;  %v2748_v26 = vand.u32 2147483647, %v945_v30  ;;  %v1040_v55 = vand.u32 2147483647, %v1036_v46  ;;  %v1041_v47 = vand.u32 2147483647, %v1037_v48 }
 0x11d   :  { %v1148_v44 = vsub.f32 %v3207_v54, %v1144_v58  ;;  %v1042_v35 = vand.u32 2147483647, %v1038_v9  ;;  %v3208_v45 = vrot.slane %v3200_v15, %v2086_v39  ;;  %v1043_v16 = vand.u32 2147483647, %v1039_v1  ;;  %v3209_v42 = vld [vmem:[#allocation30_spill] sm:$0xff]  ;;  %v3212_v46 = vld [vmem:[#allocation31_spill] sm:$0xff]  ;;  %v1183_v63 = vpop.permute.xlu1 %1182 }
 0x11e   :  { %v1150_v40 = vand.u32 2147483647, %v1146_v8  ;;  %v1091_v32 = vsub.f32 %v3209_v42, %v1089_v12  ;;  %v1151_v53 = vand.u32 2147483647, %v1147_v21  ;;  %v3211_v24 = vrot.slane %v3210_v60, %v2080_v36  ;;  %v3214_v9 = vld [vmem:[#allocation34_spill] sm:$0xff] }
 0x11f   :  { %v1149_v0 = vsub.f32 %v3208_v45, %v1144_v58  ;;  %v1152_v30 = vand.u32 2147483647, %v1148_v44  ;;  %v1092_v15 = vsub.f32 %v3212_v46, %v1089_v12  ;;  %v3213_v58 = vld [vmem:[#allocation33_spill] sm:$0xff]  ;;  %v1094_v54 = vsub.f32 %v3214_v9, %v1089_v12 }
 0x120   :  { %v1224_v2 = vsub.f32 %v3211_v24, %v1222_v34  ;;  %v1093_v48 = vsub.f32 %v3213_v58, %v1089_v12  ;;  %v3215_v45 = vrot.slane %v3210_v60, %v2082_v37  ;;  %v1044_v20 = vmax.f32 %v989_v19, %v1040_v55 }
 0x121   :  { %v1045_v8 = vmax.f32 %v990_v13, %v1041_v47  ;;  %v1046_v57 = vmax.f32 %v991_v31, %v1042_v35  ;;  %v1095_v41 = vand.u32 2147483647, %v1091_v32  ;;  %v1047_v21 = vmax.f32 %v992_v43, %v1043_v16  ;;  %v3218_v31 = vld [vmem:[#allocation27_spill] sm:$0xff]  ;;  %v1105_v47 = vpop.permute.xlu0 %1104 }
 0x122   :  { %v1225_v1 = vsub.f32 %v3215_v45, %v1222_v34  ;;  %v1096_v44 = vand.u32 2147483647, %v1092_v15  ;;  %v1097_v28 = vand.u32 2147483647, %v1093_v48  ;;  %v1098_v17 = vand.u32 2147483647, %v1094_v54 }
 0x123   :  { %v1099_v29 = vmax.f32 %v1044_v20, %v1095_v41  ;;  %v1153_v24 = vand.u32 2147483647, %v1149_v0  ;;  %v3216_v51 = vrot.slane %v3210_v60, %v2084_v38  ;;  %v3217_v12 = vrot.slane %v3210_v60, %v2086_v39 }
 0x124   :  { %v1100_v45 = vmax.f32 %v1045_v8, %v1096_v44  ;;  %v1101_v19 = vmax.f32 %v1046_v57, %v1097_v28  ;;  %v1102_v13 = vmax.f32 %v1047_v21, %v1098_v17  ;;  %v3219_v43 = vrot.slane %v3218_v31, %v2080_v36  ;;  %v995_v8 = vpop.permute.xlu1 %994 }
 0x125   :  { %v1226_v49 = vsub.f32 %v3216_v51, %v1222_v34  ;;  %v1227_v56 = vsub.f32 %v3217_v12, %v1222_v34  ;;  %v1154_v35 = vmax.f32 %v1099_v29, %v1150_v40  ;;  %v3220_v41 = vrot.slane %v3218_v31, %v2082_v37 }
 0x126   :  { %v1185_v55 = vsub.f32 %v3219_v43, %v1183_v63  ;;  %v3221_v51 = vrot.slane %v3218_v31, %v2084_v38  ;;  %v3222_v34 = vrot.slane %v3218_v31, %v2086_v39  ;;  %v1155_v28 = vmax.f32 %v1100_v45, %v1151_v53 }
 0x127   :  { %v1186_v0 = vsub.f32 %v3220_v41, %v1183_v63  ;;  %v1228_v57 = vand.u32 2147483647, %v1224_v2  ;;  %v1229_v32 = vand.u32 2147483647, %v1225_v1  ;;  %v1156_v60 = vmax.f32 %v1101_v19, %v1152_v30  ;;  %v1355_v2 = vpop.permute.xlu0 %1354 }
 0x128   :  { %v1187_v20 = vsub.f32 %v3221_v51, %v1183_v63  ;;  %v1188_v16 = vsub.f32 %v3222_v34, %v1183_v63  ;;  %v1189_v17 = vand.u32 2147483647, %v1185_v55  ;;  %v1107_v29 = vsub.f32 %v3209_v42, %v1105_v47 }
 0x129   :  { %v1190_v15 = vand.u32 2147483647, %v1186_v0  ;;  %v1157_v40 = vmax.f32 %v1102_v13, %v1153_v24  ;;  %v1108_v21 = vsub.f32 %v3212_v46, %v1105_v47  ;;  %v1109_v44 = vsub.f32 %v3213_v58, %v1105_v47 }
 0x12a   :  { %v1191_v48 = vand.u32 2147483647, %v1187_v20  ;;  %v1192_v54 = vand.u32 2147483647, %v1188_v16  ;;  %v1193_v12 = vmax.f32 %v1154_v35, %v1189_v17  ;;  %v997_v63 = vsub.f32 %v3192_v61, %v995_v8  ;;  %v1050_v35 = vpop.permute.xlu1 %1049 }
 0x12b   :  { %v1194_v43 = vmax.f32 %v1155_v28, %v1190_v15  ;;  %v1110_v53 = vsub.f32 %v3214_v9, %v1105_v47  ;;  %v953_v30 = vmax.f32 %v2729_v18, %v2748_v26  ;;  %v998_v1 = vsub.f32 %v3197_v10, %v995_v8 }
 0x12c   :  { %v999_v42 = vsub.f32 %v3198_v23, %v995_v8  ;;  %v1000_v24 = vsub.f32 %v3199_v7, %v995_v8  ;;  %v1195_v45 = vmax.f32 %v1156_v60, %v1191_v48  ;;  %v1230_v46 = vand.u32 2147483647, %v1226_v49 }
 0x12d   :  { %v1231_v19 = vand.u32 2147483647, %v1227_v56  ;;  %v1111_v58 = vand.u32 2147483647, %v1107_v29  ;;  %v1196_v13 = vmax.f32 %v1157_v40, %v1192_v54  ;;  %v1001_v31 = vand.u32 2147483647, %v997_v63 }
 0x12e   :  { %v1112_v55 = vand.u32 2147483647, %v1108_v21  ;;  %v1357_v61 = vsub.f32 %v2578_v5, %v1355_v2  ;;  %v1232_v9 = vmax.f32 %v1193_v12, %v1228_v57  ;;  %v1233_v47 = vmax.f32 %v1194_v43, %v1229_v32  ;;  %v1426_v57 = vpop.permute.xlu0 %1425  ;;  %v3226_v54 = vld [vmem:[#allocation35_spill] sm:$0xff]  ;;  %v3228_v12 = vld [vmem:[#allocation40_spill] sm:$0xff] }
 0x12f   :  { %v1113_v41 = vand.u32 2147483647, %v1109_v44  ;;  %v1114_v18 = vand.u32 2147483647, %v1110_v53  ;;  %v1002_v26 = vand.u32 2147483647, %v998_v1  ;;  %v1052_v23 = vsub.f32 %v3203_v52, %v1050_v35 }
 0x130   :  { %v1003_v10 = vand.u32 2147483647, %v999_v42  ;;  %v1004_v0 = vand.u32 2147483647, %v1000_v24  ;;  %v1234_v7 = vmax.f32 %v1195_v45, %v1230_v46  ;;  %v1053_v49 = vsub.f32 %v3204_v22, %v1050_v35 }
 0x131   :  { %v1054_v56 = vsub.f32 %v3205_v59, %v1050_v35  ;;  %v1055_v51 = vsub.f32 %v3206_v33, %v1050_v35  ;;  %v1235_v20 = vmax.f32 %v1196_v13, %v1231_v19  ;;  %v3223_v34 = vmax.f32 %v2713_v25, %v2727_v27  ;;  %v1261_v25 = vpop.permute.xlu1 %1260  ;;  %v3232_v19 = vld [vmem:[#allocation41_spill] sm:$0xff] }
 0x132   :  { %v1056_v28 = vand.u32 2147483647, %v1052_v23  ;;  %v1358_v17 = vsub.f32 %v2614_v14, %v1355_v2  ;;  %v1057_v32 = vand.u32 2147483647, %v1053_v49  ;;  %v1359_v52 = vsub.f32 %v2617_v6, %v1355_v2 }
 0x133   :  { %v1005_v16 = vmax.f32 %v3223_v34, %v1001_v31  ;;  %v1058_v60 = vand.u32 2147483647, %v1054_v56  ;;  %v1059_v15 = vand.u32 2147483647, %v1055_v51  ;;  %v3224_v22 = vmax.f32 %v2722_v62, %v2737_v4  ;;  %v3233_v31 = vld [vmem:[#allocation43_spill] sm:$0xff] }
 0x134   :  { %v3225_v33 = vmax.f32 %v2724_v50, %v2739_v11  ;;  %v1008_v29 = vmax.f32 %v953_v30, %v1004_v0  ;;  %v1360_v27 = vsub.f32 %v2623_v3, %v1355_v2  ;;  %v3227_v8 = vrot.slane %v3226_v54, %v2080_v36  ;;  %v3234_v0 = vld [vmem:[#allocation44_spill] sm:$0xff] }
 0x135   :  { %v1006_v59 = vmax.f32 %v3224_v22, %v1002_v26  ;;  %v1060_v40 = vmax.f32 %v1005_v16, %v1056_v28  ;;  %v2817_v44 = vand.u32 2147483647, %v1357_v61  ;;  %v1428_v43 = vsub.f32 %v3228_v12, %v1426_v57  ;;  %v3235_v16 = vld [vmem:[#allocation36_spill] sm:$0xff] }
 0x136   :  { %v1007_v48 = vmax.f32 %v3225_v33, %v1003_v10  ;;  %v1263_v21 = vsub.f32 %v3227_v8, %v1261_v25  ;;  %v1063_v4 = vmax.f32 %v1008_v29, %v1059_v15  ;;  %v3229_v50 = vrot.slane %v3226_v54, %v2082_v37  ;;  %v1300_v10 = vpop.permute.xlu1 %1299 }
 0x137   :  { %v1061_v63 = vmax.f32 %v1006_v59, %v1057_v32  ;;  %v3230_v53 = vrot.slane %v3226_v54, %v2084_v38  ;;  %v3231_v30 = vrot.slane %v3226_v54, %v2086_v39  ;;  %v1362_v42 = vand.u32 2147483647, %v1358_v17  ;;  %v3238_v59 = vld [vmem:[#allocation39_spill] sm:$0xff] }
 0x138   :  { %v1062_v62 = vmax.f32 %v1007_v48, %v1058_v60  ;;  %v1264_v11 = vsub.f32 %v3229_v50, %v1261_v25  ;;  %v2829_v24 = vand.u32 2147483647, %v1359_v52  ;;  %v1267_v45 = vand.u32 2147483647, %v1263_v21  ;;  %v3236_v60 = vld [vmem:[#allocation37_spill] sm:$0xff]  ;;  %v3239_v48 = vld [vmem:[#allocation42_spill] sm:$0xff] }
 0x139   :  { %v1265_v2 = vsub.f32 %v3230_v53, %v1261_v25  ;;  %v1266_v1 = vsub.f32 %v3231_v30, %v1261_v25  ;;  %v2831_v46 = vand.u32 2147483647, %v1360_v27  ;;  %v1429_v13 = vsub.f32 %v3232_v19, %v1426_v57  ;;  %v1496_v21 = vld [vmem:[#allocation7 + $0x80] ss:$8 sm:$0xf] }
 0x13a   :  { %v1430_v61 = vsub.f32 %v3233_v31, %v1426_v57  ;;  %v2835_v35 = vmax.f32 %v1060_v40, %v1111_v58  ;;  %v1268_v26 = vand.u32 2147483647, %v1264_v11  ;;  %v1431_v23 = vsub.f32 %v3234_v0, %v1426_v57  ;;  %v3237_v58 = vld [vmem:[#allocation38_spill] sm:$0xff] }
 0x13b   :  { %v2838_v49 = vand.u32 2147483647, %v1428_v43  ;;  %v2840_v56 = vmax.f32 %v1061_v63, %v1112_v55  ;;  %v2842_v51 = vmax.f32 %v1062_v62, %v1113_v41  ;;  %v2844_v34 = vmax.f32 %v1063_v4, %v1114_v18  ;;  %v1316_v18 = vpop.permute.xlu1 %1315 }
 0x13c   :  { %v1302_v28 = vsub.f32 %v3235_v16, %v1300_v10  ;;  %v1269_v17 = vand.u32 2147483647, %v1265_v2  ;;  %v1270_v32 = vand.u32 2147483647, %v1266_v1  ;;  %v1303_v15 = vsub.f32 %v3236_v60, %v1300_v10 }
 0x13d   :  { %v1304_v52 = vsub.f32 %v3237_v58, %v1300_v10  ;;  %v1271_v22 = vmax.f32 %v1232_v9, %v1267_v45  ;;  %v1305_v33 = vsub.f32 %v3238_v59, %v1300_v10  ;;  %v2852_v55 = vrot.slane %v3239_v48, %v2084_v38 }
 0x13e   :  { %v1306_v57 = vand.u32 2147483647, %v1302_v28  ;;  %v1272_v41 = vmax.f32 %v1233_v47, %v1268_v26  ;;  %v1307_v29 = vand.u32 2147483647, %v1303_v15  ;;  %v2854_v25 = vand.u32 2147483647, %v1429_v13 }
 0x13f   :  { %v2856_v27 = vand.u32 2147483647, %v1430_v61  ;;  %v1308_v40 = vand.u32 2147483647, %v1304_v52  ;;  %v1318_v54 = vsub.f32 %v3235_v16, %v1316_v18  ;;  %v1319_v8 = vsub.f32 %v3236_v60, %v1316_v18  ;;  %v1371_v13 = vpop.permute.xlu1 %1370 }
 0x140   :  { %v1320_v9 = vsub.f32 %v3237_v58, %v1316_v18  ;;  %v1273_v43 = vmax.f32 %v1234_v7, %v1269_v17  ;;  %v1274_v63 = vmax.f32 %v1235_v20, %v1270_v32  ;;  %v1321_v62 = vsub.f32 %v3238_v59, %v1316_v18  ;;  %v2883_v17 = vpop.permute.xlu0 %1519 }
 0x141   :  { %v2862_v4 = vand.u32 2147483647, %v1431_v23  ;;  %v1309_v47 = vand.u32 2147483647, %v1305_v33  ;;  %v1310_v50 = vmax.f32 %v1271_v22, %v1306_v57  ;;  %v1311_v11 = vmax.f32 %v1272_v41, %v1307_v29 }
 0x142   :  { %v2866_v53 = vrot.slane %v3239_v48, %v2086_v39  ;;  %v1322_v2 = vand.u32 2147483647, %v1318_v54  ;;  %v1323_v30 = vand.u32 2147483647, %v1319_v8  ;;  %v2869_v1 = vrot.slane %v1496_v21, %v2080_v36 }
 0x143   :  { %v2872_v45 = vrot.slane %v1496_v21, %v2082_v37  ;;  %v1312_v7 = vmax.f32 %v1273_v43, %v1308_v40  ;;  %v1324_v20 = vand.u32 2147483647, %v1320_v9  ;;  %v2875_v61 = vrot.slane %v1496_v21, %v2084_v38 }
 0x144   :  { %v2878_v26 = vrot.slane %v1496_v21, %v2086_v39  ;;  %v1325_v10 = vand.u32 2147483647, %v1321_v62  ;;  %v1373_v23 = vsub.f32 %v2578_v5, %v1371_v13  ;;  %v1374_v16 = vsub.f32 %v2614_v14, %v1371_v13 }
 0x145   :  { %v1375_v28 = vsub.f32 %v2617_v6, %v1371_v13  ;;  %v1313_v32 = vmax.f32 %v1274_v63, %v1309_v47  ;;  %v1365_v60 = vmax.f32 %v1310_v50, %v2817_v44  ;;  %v1366_v15 = vmax.f32 %v1311_v11, %v1362_v42  ;;  %v1410_v44 = vpop.permute.xlu1 %1409 }
 0x146   :  { %v1376_v58 = vsub.f32 %v2623_v3, %v1371_v13  ;;  %v1326_v52 = vmax.f32 %v2835_v35, %v1322_v2  ;;  %v1327_v22 = vmax.f32 %v2840_v56, %v1323_v30  ;;  %v1377_v59 = vand.u32 2147483647, %v1373_v23  ;;  %v1551_v35 = vld [vmem:[#allocation7 + $0x81] ss:$8 sm:$0xf] }
 0x147   :  { %v1378_v33 = vand.u32 2147483647, %v1374_v16  ;;  %v1328_v5 = vmax.f32 %v2842_v51, %v1324_v20  ;;  %v1379_v57 = vand.u32 2147483647, %v1375_v28  ;;  %v1522_v6 = vsub.f32 %v2869_v1, %v2883_v17  ;;  %v3240_v2 = vld [vmem:[#allocation45_spill] sm:$0xff]  ;;  %v1591_v16 = vpop.permute.xlu0 %1590 }
 0x148   :  { %v1380_v14 = vand.u32 2147483647, %v1376_v58  ;;  %v1329_v48 = vmax.f32 %v2844_v34, %v1325_v10  ;;  %v2893_v41 = vmax.f32 %v1326_v52, %v1377_v59  ;;  %v1523_v3 = vsub.f32 %v2872_v45, %v2883_v17 }
 0x149   :  { %v1524_v42 = vsub.f32 %v2875_v61, %v2883_v17  ;;  %v2899_v56 = vmax.f32 %v1327_v22, %v1378_v33  ;;  %v1412_v51 = vsub.f32 %v3228_v12, %v1410_v44  ;;  %v1413_v29 = vsub.f32 %v3232_v19, %v1410_v44  ;;  %v1465_v50 = vpop.permute.xlu1 %1464 }
 0x14a   :  { %v1414_v18 = vsub.f32 %v3233_v31, %v1410_v44  ;;  %v1367_v34 = vmax.f32 %v1312_v7, %v2829_v24  ;;  %v1368_v40 = vmax.f32 %v1313_v32, %v2831_v46  ;;  %v1415_v54 = vsub.f32 %v3234_v0, %v1410_v44  ;;  %v3241_v7 = vld [vmem:[#allocation46_spill] sm:$0xff] }
 0x14b   :  { %v1525_v8 = vsub.f32 %v2878_v26, %v2883_v17  ;;  %v2909_v9 = vmax.f32 %v1328_v5, %v1379_v57  ;;  %v2911_v21 = vmax.f32 %v1329_v48, %v1380_v14  ;;  %v2913_v43 = vand.u32 2147483647, %v1522_v6  ;;  %v1606_v48 = vld [vmem:[#allocation7 + $0x82] ss:$8 sm:$0xf] }
 0x14c   :  { %v2916_v12 = vrot.slane %v1551_v35, %v2080_v36  ;;  %v1436_v19 = vmax.f32 %v2893_v41, %v2838_v49  ;;  %v2920_v24 = vand.u32 2147483647, %v1523_v3  ;;  %v2922_v46 = vand.u32 2147483647, %v1524_v42 }
 0x14d   :  { %v2925_v31 = vrot.slane %v1551_v35, %v2082_v37  ;;  %v1437_v0 = vmax.f32 %v2899_v56, %v2854_v25  ;;  %v1416_v63 = vand.u32 2147483647, %v1412_v51  ;;  %v1417_v62 = vand.u32 2147483647, %v1413_v29 }
 0x14e   :  { %v1418_v47 = vand.u32 2147483647, %v1414_v18  ;;  %v1419_v11 = vand.u32 2147483647, %v1415_v54  ;;  %v1467_v30 = vsub.f32 %v3240_v2, %v1465_v50  ;;  %v1468_v20 = vsub.f32 %v3241_v7, %v1465_v50 }
 0x14f   :  { %v1469_v49 = vsub.f32 %v2852_v55, %v1465_v50  ;;  %v1438_v13 = vmax.f32 %v2909_v9, %v2856_v27  ;;  %v1439_v10 = vmax.f32 %v2911_v21, %v2862_v4  ;;  %v1470_v23 = vsub.f32 %v2866_v53, %v1465_v50  ;;  %v1481_v27 = vpop.permute.xlu1 %1480  ;;  %v1661_v50 = vld [vmem:[#allocation7 + $0x83] ss:$8 sm:$0xf] }
 0x150   :  { %v2938_v25 = vrot.slane %v1551_v35, %v2084_v38  ;;  %v1471_v28 = vand.u32 2147483647, %v1467_v30  ;;  %v1472_v17 = vand.u32 2147483647, %v1468_v20  ;;  %v2941_v58 = vrot.slane %v1551_v35, %v2086_v39 }
 0x151   :  { %v1473_v32 = vand.u32 2147483647, %v1469_v49  ;;  %v1420_v52 = vmax.f32 %v1365_v60, %v1416_v63  ;;  %v1421_v22 = vmax.f32 %v1366_v15, %v1417_v62  ;;  %v1422_v59 = vmax.f32 %v1367_v34, %v1418_v47 }
 0x152   :  { %v1474_v33 = vand.u32 2147483647, %v1470_v23  ;;  %v1423_v5 = vmax.f32 %v1368_v40, %v1419_v11  ;;  %v1483_v57 = vsub.f32 %v3240_v2, %v1481_v27  ;;  %v1593_v14 = vsub.f32 %v2916_v12, %v1591_v16 }
 0x153   :  { %v1594_v6 = vsub.f32 %v2925_v31, %v1591_v16  ;;  %v2946_v41 = vmax.f32 %v1420_v52, %v1471_v28  ;;  %v2948_v44 = vmax.f32 %v1421_v22, %v1472_v17  ;;  %v1484_v3 = vsub.f32 %v3241_v7, %v1481_v27  ;;  %v1536_v54 = vpop.permute.xlu1 %1535 }
 0x154   :  { %v1485_v60 = vsub.f32 %v2852_v55, %v1481_v27  ;;  %v2952_v15 = vmax.f32 %v1422_v59, %v1473_v32  ;;  %v2954_v42 = vand.u32 2147483647, %v1525_v8  ;;  %v1595_v35 = vsub.f32 %v2938_v25, %v1591_v16  ;;  %v1685_v32 = vpop.permute.xlu0 %1684 }
 0x155   :  { %v1596_v56 = vsub.f32 %v2941_v58, %v1591_v16  ;;  %v2958_v51 = vmax.f32 %v1423_v5, %v1474_v33  ;;  %v1486_v29 = vsub.f32 %v2866_v53, %v1481_v27  ;;  %v1487_v18 = vand.u32 2147483647, %v1483_v57 }
 0x156   :  { %v2962_v34 = vrot.slane %v1606_v48, %v2080_v36  ;;  %v1488_v40 = vand.u32 2147483647, %v1484_v3  ;;  %v2964_v9 = vand.u32 2147483647, %v1593_v14  ;;  %v2966_v55 = vand.u32 2147483647, %v1594_v6 }
 0x157   :  { %v2969_v8 = vrot.slane %v1606_v48, %v2082_v37  ;;  %v1530_v63 = vmax.f32 %v2946_v41, %v2913_v43  ;;  %v1531_v62 = vmax.f32 %v2948_v44, %v2920_v24  ;;  %v1489_v53 = vand.u32 2147483647, %v1485_v60  ;;  %v1575_v17 = vpop.permute.xlu1 %1574 }
 0x158   :  { %v1538_v47 = vsub.f32 %v2869_v1, %v1536_v54  ;;  %v1532_v11 = vmax.f32 %v2952_v15, %v2922_v46  ;;  %v1539_v2 = vsub.f32 %v2872_v45, %v1536_v54  ;;  %v1540_v30 = vsub.f32 %v2875_v61, %v1536_v54 }
 0x159   :  { %v1541_v7 = vsub.f32 %v2878_v26, %v1536_v54  ;;  %v1533_v20 = vmax.f32 %v2958_v51, %v2954_v42  ;;  %v1490_v43 = vand.u32 2147483647, %v1486_v29  ;;  %v1491_v49 = vmax.f32 %v1436_v19, %v1487_v18 }
 0x15a   :  { %v2983_v23 = vand.u32 2147483647, %v1595_v35  ;;  %v1492_v24 = vmax.f32 %v1437_v0, %v1488_v40  ;;  %v1600_v16 = vand.u32 2147483647, %v1596_v56  ;;  %v1619_v1 = vrot.slane %v1606_v48, %v2084_v38 }
 0x15b   :  { %v2987_v28 = vrot.slane %v1661_v50, %v2080_v36  ;;  %v1493_v46 = vmax.f32 %v1438_v13, %v1489_v53  ;;  %v1542_v45 = vand.u32 2147483647, %v1538_v47  ;;  %v2990_v61 = vrot.slane %v1661_v50, %v2082_v37  ;;  %v1630_v44 = vpop.permute.xlu1 %1629 }
 0x15c   :  { %v2993_v26 = vrot.slane %v1661_v50, %v2084_v38  ;;  %v1543_v19 = vand.u32 2147483647, %v1539_v2  ;;  %v1544_v52 = vand.u32 2147483647, %v1540_v30  ;;  %v1545_v22 = vand.u32 2147483647, %v1541_v7 }
 0x15d   :  { %v1577_v0 = vsub.f32 %v2916_v12, %v1575_v17  ;;  %v1578_v59 = vsub.f32 %v2925_v31, %v1575_v17  ;;  %v1579_v36 = vsub.f32 %v2938_v25, %v1575_v17  ;;  %v1580_v13 = vsub.f32 %v2941_v58, %v1575_v17 }
 0x15e   :  { %v3000_v33 = vrot.slane %v1661_v50, %v2086_v39  ;;  %v1494_v37 = vmax.f32 %v1439_v10, %v1490_v43  ;;  %v1623_v27 = vrot.slane %v1606_v48, %v2086_v39  ;;  %v1687_v5 = vsub.f32 %v2987_v28, %v1685_v32 }
 0x15f   :  { %v1581_v38 = vand.u32 2147483647, %v1577_v0  ;;  %v1546_v57 = vmax.f32 %v1491_v49, %v1542_v45  ;;  %v1582_v12 = vand.u32 2147483647, %v1578_v59  ;;  %v1688_v31 = vsub.f32 %v2990_v61, %v1685_v32  ;;  %v1646_v53 = vpop.permute.xlu1 %1645 }
 0x160   :  { %v1689_v25 = vsub.f32 %v2993_v26, %v1685_v32  ;;  %v1547_v14 = vmax.f32 %v1492_v24, %v1543_v19  ;;  %v1548_v58 = vmax.f32 %v1493_v46, %v1544_v52  ;;  %v1549_v6 = vmax.f32 %v1494_v37, %v1545_v22 }
 0x161   :  { %v1583_v41 = vand.u32 2147483647, %v1579_v36  ;;  %v1584_v3 = vand.u32 2147483647, %v1580_v13  ;;  %v1585_v60 = vmax.f32 %v1530_v63, %v1581_v38  ;;  %v1632_v4 = vsub.f32 %v2962_v34, %v1630_v44 }
 0x162   :  { %v1690_v21 = vsub.f32 %v3000_v33, %v1685_v32  ;;  %v1633_v39 = vsub.f32 %v2969_v8, %v1630_v44  ;;  %v1634_v10 = vsub.f32 %v1619_v1, %v1630_v44  ;;  %v1635_v48 = vsub.f32 %v1623_v27, %v1630_v44 }
 0x163   :  { %v1691_v15 = vand.u32 2147483647, %v1687_v5  ;;  %v1586_v42 = vmax.f32 %v1531_v62, %v1582_v12  ;;  %v1636_v35 = vand.u32 2147483647, %v1632_v4  ;;  %v1692_v56 = vand.u32 2147483647, %v1688_v31 }
 0x164   :  { %v1693_v51 = vand.u32 2147483647, %v1689_v25  ;;  %v1587_v29 = vmax.f32 %v1532_v11, %v1583_v41  ;;  %v1637_v18 = vand.u32 2147483647, %v1633_v39  ;;  %v1638_v40 = vand.u32 2147483647, %v1634_v10 }
 0x165   :  { %v1639_v54 = vand.u32 2147483647, %v1635_v48  ;;  %v1588_v47 = vmax.f32 %v1533_v20, %v1584_v3  ;;  %v1648_v63 = vsub.f32 %v2962_v34, %v1646_v53  ;;  %v1649_v50 = vsub.f32 %v2969_v8, %v1646_v53  ;;  %v1701_v34 = vpop.permute.xlu1 %1700 }
 0x166   :  { %v1650_v2 = vsub.f32 %v1619_v1, %v1646_v53  ;;  %v1640_v30 = vmax.f32 %v1585_v60, %v1636_v35  ;;  %v1641_v7 = vmax.f32 %v1586_v42, %v1637_v18  ;;  %v1642_v43 = vmax.f32 %v1587_v29, %v1638_v40 }
 0x167   :  { %v1651_v49 = vsub.f32 %v1623_v27, %v1646_v53  ;;  %v1601_v62 = vmax.f32 %v1546_v57, %v2964_v9  ;;  %v1643_v24 = vmax.f32 %v1588_v47, %v1639_v54  ;;  %v1694_v46 = vand.u32 2147483647, %v1690_v21 }
 0x168   :  { %v1652_v45 = vand.u32 2147483647, %v1648_v63  ;;  %v1653_v11 = vand.u32 2147483647, %v1649_v50  ;;  %v1602_v17 = vmax.f32 %v1547_v14, %v2966_v55  ;;  %v1603_v32 = vmax.f32 %v1548_v58, %v2983_v23 }
 0x169   :  { %v1604_v20 = vmax.f32 %v1549_v6, %v1600_v16  ;;  %v1654_v19 = vand.u32 2147483647, %v1650_v2  ;;  %v1695_v52 = vmax.f32 %v1640_v30, %v1691_v15  ;;  %v1696_v8 = vmax.f32 %v1641_v7, %v1692_v56 }
 0x16a   :  { %v1697_v1 = vmax.f32 %v1642_v43, %v1693_v51  ;;  %v1655_v22 = vand.u32 2147483647, %v1651_v49  ;;  %v1703_v0 = vsub.f32 %v2987_v28, %v1701_v34  ;;  %v1704_v59 = vsub.f32 %v2990_v61, %v1701_v34 }
 0x16b   :  { %v1705_v9 = vsub.f32 %v2993_v26, %v1701_v34  ;;  %v1706_v36 = vsub.f32 %v3000_v33, %v1701_v34  ;;  %v1698_v13 = vmax.f32 %v1643_v24, %v1694_v46  ;;  %v1656_v37 = vmax.f32 %v1601_v62, %v1652_v45 }
 0x16c   :  { %v1657_v55 = vmax.f32 %v1602_v17, %v1653_v11  ;;  %v1658_v23 = vmax.f32 %v1603_v32, %v1654_v19  ;;  %v1707_v16 = vand.u32 2147483647, %v1703_v0  ;;  %v1708_v38 = vand.u32 2147483647, %v1704_v59 }
 0x16d   :  { %v1709_v27 = vand.u32 2147483647, %v1705_v9  ;;  %v1719_v5 = vrot.slane %v1695_v52, 4  ;;  %v1720_v57 = vrot.slane %v1696_v8, 4  ;;  %v1659_v12 = vmax.f32 %v1604_v20, %v1655_v22 }
 0x16e   :  { %v1710_v31 = vand.u32 2147483647, %v1706_v36  ;;  %v1721_v28 = vrot.slane %v1697_v1, 4  ;;  %v1711_v61 = vmax.f32 %v1656_v37, %v1707_v16  ;;  %v1712_v25 = vmax.f32 %v1657_v55, %v1708_v38 }
 0x16f   :  { %v1713_v26 = vmax.f32 %v1658_v23, %v1709_v27  ;;  %v1722_v14 = vrot.slane %v1698_v13, 4 }
 0x170   :  { %v1714_v33 = vmax.f32 %v1659_v12, %v1710_v31  ;;  %v1728_v58 = vsel %vm1727_vm0, %v1711_v61, %v1719_v5  ;;  %v1729_v6 = vsel %vm1727_vm0, %v1712_v25, %v1720_v57 }
 0x171   :  { %v1730_v41 = vsel %vm1727_vm0, %v1713_v26, %v1721_v28  ;;  %1732 = vst [vmem:[#allocation8] sm:$0xff] %v1728_v58  ;;  %1733 = vst [vmem:[#allocation8 + $0x8] sm:$0xff] %v1729_v6 }
 0x172   :  { %v1731_v44 = vsel %vm1727_vm0, %v1714_v33, %v1722_v14  ;;  %1734 = vst [vmem:[#allocation8 + $0x10] sm:$0xff] %v1730_v41 }
 0x173   :  { %1735 = vst [vmem:[#allocation8 + $0x18] sm:$0xff] %v1731_v44 }
 0x174   :  { %1918 = shalt.err (!%p1915_p0)
}
 0x175   :  { %s1919_s25 = scalar_lea.hbm %s3040_s3, 512 }
 0x176   :  { %p1920_p1 = scmp.ne.s32.totalorder %s3040_s3, %s1919_s25  ;;  %p1923_p2 = scmp.lt.u32.totalorder %s1919_s25, %s3040_s3 }
 0x178   :  { %p1925_p3 = pnand %p1923_p2, %p1920_p1 }
 0x17a   :  { %1928 = shalt.err (!%p1925_p3)
}
 0x17b   :  { %1745 = dma.vmem_to_hbm [thread:$0]  %s1743_s21, 512, %s3040_s3, [#allocation4]  }
 0x17c   :  { %1933 = dma.done.wait [#allocation4], 512  }
 0x17d   :  { %1934 = vsyncadd [#allocation4], 4294966784 }
 0x17e   :  { %1749 = vsyncpa [#allocation3], 1 }
 0x17f   :  { %1750 = vsyncpa [#allocation6], 1 }
 0x180   :  { %1751 = vsyncpa [#allocation4], 1 }

</bundles_post_ra>
